<compile_context>
chip_gen: v7x
topology: tpu7x:2x2x1
jax: 0.10.0
libtpu: 0.0.40
codegen_flags: <defaults>
</compile_context>

<pallas_src>
import functools

import numpy as np
import jax
import jax.numpy as jnp
from jax.experimental import pallas as pl
from jax.experimental.pallas import tpu as pltpu


# ----------------------------------------------------------------------------
# Kernel.  One (batch, point-tile) per grid step, channel-major:
#   activations are [C, chunk] (channels on sublanes, points on lanes).
#   The tile is processed in fully unrolled lane sub-chunks so inter-layer
#   activations stay in vregs; each chunk runs
#     encoder MLP 3 -> 64 -> 128 -> 128 (layer 1 on the VPU, rest on MXU)
#     regressor MLP 128 -> 128 -> 128 -> P*R (MXU, bf16 in / f32 accumulate)
#   followed by the per-part masked partial sums + counts for this tile.
# ----------------------------------------------------------------------------
def _rotreg_kernel(cam_ref, lab_ref, cpart_ref,
                   w1, b1, w2, b2, w345, b345, w6, b6,
                   raw_ref, sums_ref, cnts_ref, *, chunk, n_chunks):
    # Weight loads / casts hoisted out of the chunk loop (traced once).
    w1f = w1[...].astype(jnp.float32)              # [64, 3]
    b1v = b1[...]                                  # [64, 1] f32
    w2v, b2v = w2[...], b2[...]                    # [128, 64] bf16, [128, 1] f32
    w3v, w4v, w5v = w345[0], w345[1], w345[2]      # [128, 128] bf16 each
    b3v, b4v, b5v = b345[0], b345[1], b345[2]      # [128, 1] f32 each
    w6v, b6v = w6[...], b6[...]                    # [pr, 128] bf16, [pr, 1] f32
    cpart = cpart_ref[...]                         # [pr, 1] int32 channel -> part id
    pr = cpart.shape[0]

    def dense(hv, w, b, relu=True):
        y = jnp.dot(w, hv, preferred_element_type=jnp.float32) + b
        if relu:
            y = jnp.maximum(y, 0.0).astype(jnp.bfloat16)
        return y

    sums = jnp.zeros((pr, 1), jnp.float32)
    cnts = jnp.zeros((pr, 1), jnp.float32)

    # Fully unrolled sub-chunk loop: static lane offsets -> unmasked,
    # lane-aligned loads/stores; activations stay register resident per chunk.
    for c in range(n_chunks):
        off = c * chunk
        x = cam_ref[0, :, off:off + chunk].astype(jnp.float32)    # [3, chunk]
        lab = lab_ref[0, :, off:off + chunk]                      # [1, chunk] i32

        # Layer 1 (3 -> 64) on the VPU: three broadcast FMAs (K=3 would waste
        # an MXU pass while the VALU slots sit idle during the 128-wide layers).
        h = (b1v
             + w1f[:, 0:1] * x[0:1, :]
             + w1f[:, 1:2] * x[1:2, :]
             + w1f[:, 2:3] * x[2:3, :])                           # [64, chunk] f32
        h = jnp.maximum(h, 0.0).astype(jnp.bfloat16)

        # Remaining 1x1-conv layers: bf16 MXU matmuls, f32 accumulation.
        h = dense(h, w2v, b2v)
        feat = dense(h, w3v, b3v)                  # encoder output, [128, chunk]
        g = dense(feat, w4v, b4v)
        g = dense(g, w5v, b5v)
        raw = dense(g, w6v, b6v, relu=False)       # [pr, chunk] f32

        # Lane-dense store of the raw per-point prediction (points on lanes).
        raw_ref[0, :, off:off + chunk] = raw.astype(raw_ref.dtype)

        # Masked partial reduction.  Padded points carry label == num_parts,
        # which never matches cpart (< num_parts), so they contribute nothing.
        mask = (cpart == lab).astype(jnp.float32)                 # [pr, chunk]
        sums = sums + jnp.sum(mask * raw, axis=1, keepdims=True)
        cnts = cnts + jnp.sum(mask, axis=1, keepdims=True)

    sums_ref[0, 0] = sums
    cnts_ref[0, 0] = cnts


# ----------------------------------------------------------------------------
# Tile / padding choice.
# ----------------------------------------------------------------------------
_STEP_OVERHEAD_POINTS = 512   # ~0.35 us per grid step, in point-equivalents


def _choose_tiling(n, batch, max_tile=4096, min_steps=4):
    """Returns (n_padded, tile): tile is a multiple of 256 (<= max_tile), n is
    padded to a multiple of tile.  Prefers tilings that give >= min_steps grid
    steps (v7x 2-TC sharding) and balances pad waste vs per-step overhead."""
    cands = list(range(256, max_tile + 1, 256))

    def steps(t):
        return batch * (-(-n // t))

    feasible = [t for t in cands if steps(t) >= min_steps] or cands

    def score(t):
        n_pad = (-(-n // t)) * t
        return (n_pad - n) + steps(t) * _STEP_OVERHEAD_POINTS

    tile = min(feasible, key=score)
    n_pad = (-(-n // tile)) * tile
    return n_pad, tile


# ----------------------------------------------------------------------------
# Wrapper.
# ----------------------------------------------------------------------------
def rotation_regression_forward(cam, labels, params, default_vec,
                                num_parts, rot_dim,
                                point_pred_dtype=jnp.bfloat16):
    """cam: [B, N, 3]; labels: [B, N] int; params: [(w[din,dout] bf16,
    b[dout] f32)] * 6; returns dict like the torch module.  point_pred_dtype
    controls the per-point raw prediction precision (bf16 halves HBM
    writeback; pass jnp.float32 to match the torch output dtype exactly)."""
    B, N, _ = cam.shape
    pr = num_parts * rot_dim

    n_pad, tile = _choose_tiling(N, B)
    chunk = 512 if tile % 512 == 0 else 256
    n_chunks = tile // chunk
    T = n_pad // tile
    pad = n_pad - N

    cam_t = jnp.transpose(cam, (0, 2, 1)).astype(jnp.bfloat16)     # [B, 3, N]
    lab = labels.astype(jnp.int32)
    if pad:
        cam_t = jnp.pad(cam_t, ((0, 0), (0, 0), (0, pad)))
        lab = jnp.pad(lab, ((0, 0), (0, pad)), constant_values=num_parts)
    lab3 = lab.reshape(B, 1, n_pad)

    # channel -> part-id lookup computed once (replaces per-step iota // rot_dim)
    cpart = (jnp.arange(pr, dtype=jnp.int32) // rot_dim).reshape(pr, 1)

    # Weights transposed to [dout, din]; the three identically shaped 128x128
    # layers (and their biases) are stacked into single inputs to cut the
    # number of per-step BlockSpecs / DMA descriptors.
    (w1, b1), (w2, b2), (w3, b3), (w4, b4), (w5, b5), (w6, b6) = params
    w1t = jnp.transpose(w1).astype(jnp.bfloat16)
    w2t = jnp.transpose(w2).astype(jnp.bfloat16)
    w345 = jnp.stack([jnp.transpose(w3), jnp.transpose(w4),
                      jnp.transpose(w5)]).astype(jnp.bfloat16)
    w6t = jnp.transpose(w6).astype(jnp.bfloat16)
    b1c = b1.reshape(-1, 1).astype(jnp.float32)
    b2c = b2.reshape(-1, 1).astype(jnp.float32)
    b345 = jnp.stack([b3.reshape(-1, 1), b4.reshape(-1, 1),
                      b5.reshape(-1, 1)]).astype(jnp.float32)
    b6c = b6.reshape(-1, 1).astype(jnp.float32)

    def const_spec(arr):
        nd = arr.ndim
        return pl.BlockSpec(arr.shape, lambda b, t, _nd=nd: (0,) * _nd)

    in_specs = [
        pl.BlockSpec((1, 3, tile), lambda b, t: (b, 0, t)),
        pl.BlockSpec((1, 1, tile), lambda b, t: (b, 0, t)),
        const_spec(cpart),
        const_spec(w1t), const_spec(b1c),
        const_spec(w2t), const_spec(b2c),
        const_spec(w345), const_spec(b345),
        const_spec(w6t), const_spec(b6c),
    ]

    flops = 2 * B * n_pad * sum(int(w.shape[0]) * int(w.shape[1])
                                for (w, _) in params)
    w_bytes = sum(int(w.size) * 2 + int(b_.size) * 4 for (w, b_) in params)
    raw_itemsize = jnp.dtype(point_pred_dtype).itemsize
    bytes_accessed = int(B * n_pad * (3 * 2 + 4 + pr * raw_itemsize)
                         + w_bytes + 2 * B * T * pr * 4)

    kernel = functools.partial(_rotreg_kernel, chunk=chunk, n_chunks=n_chunks)
    raw, psums, pcnts = pl.pallas_call(
        kernel,
        out_shape=(jax.ShapeDtypeStruct((B, pr, n_pad), point_pred_dtype),
                   jax.ShapeDtypeStruct((B, T, pr, 1), jnp.float32),
                   jax.ShapeDtypeStruct((B, T, pr, 1), jnp.float32)),
        grid_spec=pltpu.PrefetchScalarGridSpec(
            num_scalar_prefetch=0,
            grid=(B, T),
            in_specs=in_specs,
            out_specs=[pl.BlockSpec((1, pr, tile), lambda b, t: (b, 0, t)),
                       pl.BlockSpec((1, 1, pr, 1), lambda b, t: (b, t, 0, 0)),
                       pl.BlockSpec((1, 1, pr, 1), lambda b, t: (b, t, 0, 0))],
        ),
        compiler_params=pltpu.CompilerParams(
            dimension_semantics=("parallel", "parallel"),
            vmem_limit_bytes=48 * 1024 * 1024),
        cost_estimate=pl.CostEstimate(flops=flops, transcendentals=0,
                                      bytes_accessed=bytes_accessed),
    )(cam_t, lab3, cpart, w1t, b1c, w2t, b2c, w345, b345, w6t, b6c)

    # Tiny [B, pr] epilogue: combine per-tile partials, divide, default-blend.
    sums = psums.sum(axis=(1, 3))                       # [B, pr]
    counts = pcnts.sum(axis=(1, 3))                     # [B, pr]
    weighted = sums / jnp.maximum(counts, 1.0)          # clamp_min(., 1)
    valid = (counts > 0.0).astype(jnp.float32)
    rtvec = valid * weighted + (1.0 - valid) * default_vec.reshape(1, pr)

    if pad:
        raw = raw[:, :, :N]
    point_rtvec = raw.reshape(B, num_parts, rot_dim, N)  # free reshape
    return {'rtvec': rtvec.reshape(B, num_parts, rot_dim),
            'point_rtvec': point_rtvec}


# ----------------------------------------------------------------------------
# Deterministic parameter init: bf16 weights, f32 biases.
# ----------------------------------------------------------------------------
def init_params(key, num_parts, rot_dim, backbone_out_dim=128):
    dims = [(3, 64), (64, 128), (128, backbone_out_dim),
            (backbone_out_dim, 128), (128, 128), (128, num_parts * rot_dim)]
    params = []
    for (din, dout) in dims:
        key, k1, k2 = jax.random.split(key, 3)
        w = (jax.random.normal(k1, (din, dout), jnp.float32)
             / np.sqrt(din)).astype(jnp.bfloat16)
        b = jax.random.normal(k2, (dout,), jnp.float32) * 0.01
        params.append((w, b))
    return params


# ----------------------------------------------------------------------------
# Pure-JAX reference mirroring the PyTorch forward (same bf16-in / f32-acc
# matmul precision as the kernel so the check can be tight).
# ----------------------------------------------------------------------------
def reference_forward(cam, labels, params, num_parts, rot_dim, sym):
    h = cam.astype(jnp.bfloat16)
    for i, (w, b) in enumerate(params):
        y = jnp.dot(h, w, preferred_element_type=jnp.float32) + b
        if i < len(params) - 1:
            h = jnp.maximum(y, 0.0).astype(jnp.bfloat16)
        else:
            h = y                                           # raw pred, f32
    B, N, _ = h.shape
    raw_pred = jnp.transpose(h, (0, 2, 1)).reshape(B, num_parts, rot_dim, N)

    eye_mat = jnp.concatenate(
        [jnp.eye(num_parts), jnp.zeros((2, num_parts))], axis=0)
    part_mask = eye_mat[labels]                                    # [B, N, P]
    part_mask = jnp.transpose(part_mask, (0, 2, 1))[:, :, None, :]  # [B,P,1,N]
    valid = (part_mask.sum(axis=(-1, -2)) > 0).astype(jnp.float32)[..., None]
    weighted = (raw_pred * part_mask).sum(-1) / jnp.maximum(part_mask.sum(-1), 1.0)
    if sym:
        default = jnp.array([0.0, 1.0, 0.0], jnp.float32)
    else:
        default = jnp.eye(3, dtype=jnp.float32).reshape(-1)
    weighted = valid * weighted + (1.0 - valid) * default.reshape(1, 1, -1)
    return {'rtvec': weighted, 'point_rtvec': raw_pred}


if __name__ == "__main__":
    key = jax.random.PRNGKey(0)
    B, N = 2, 256
    num_parts, sym = 2, False
    rot_dim = 3 if sym else 9

    kc, kl, kp = jax.random.split(key, 3)
    cam = jax.random.normal(kc, (B, N, 3), jnp.float32).astype(jnp.bfloat16)
    # labels in [0, num_parts+2): values >= num_parts are "invalid" (zero rows
    # of eye_mat).  Batch 1 is all-invalid to exercise the default-blend path.
    labels = jax.random.randint(kl, (B, N), 0, num_parts + 2)
    labels = labels.at[1].set(num_parts)

    params = init_params(kp, num_parts, rot_dim)
    base = (jnp.array([0.0, 1.0, 0.0], jnp.float32) if sym
            else jnp.eye(3, dtype=jnp.float32).reshape(-1))
    default_vec = jnp.tile(base, (num_parts,))

    fwd = jax.jit(functools.partial(rotation_regression_forward,
                                    num_parts=num_parts, rot_dim=rot_dim))
    pred = fwd(cam, labels, params, default_vec)
    jax.block_until_ready(pred)

    ref = reference_forward(cam, labels, params, num_parts, rot_dim, sym)
    # point_rtvec is emitted in bf16 (HBM-writeback optimization): compare
    # after upcast with a bf16-level tolerance.  rtvec is reduced from f32
    # raw values inside the kernel, so it keeps the tighter tolerance.
    np.testing.assert_allclose(np.asarray(pred['point_rtvec'], dtype=np.float32),
                               np.asarray(ref['point_rtvec'], dtype=np.float32),
                               rtol=1e-2, atol=1e-2)
    np.testing.assert_allclose(np.asarray(pred['rtvec']),
                               np.asarray(ref['rtvec']),
                               rtol=5e-3, atol=5e-3)
    print("KERNEL_OK")
</pallas_src>

<mosaic_0001>
module attributes {stable_mosaic.version = 11 : i64} {
  func.func @_rotreg_kernel(%arg0: i32, %arg1: i32, %arg2: memref<1x3x256xbf16, #tpu.memory_space<vmem>>, %arg3: memref<1x1x256xi32, #tpu.memory_space<vmem>>, %arg4: memref<18x1xi32, #tpu.memory_space<vmem>>, %arg5: memref<64x3xbf16, #tpu.memory_space<vmem>>, %arg6: memref<64x1xf32, #tpu.memory_space<vmem>>, %arg7: memref<128x64xbf16, #tpu.memory_space<vmem>>, %arg8: memref<128x1xf32, #tpu.memory_space<vmem>>, %arg9: memref<3x128x128xbf16, #tpu.memory_space<vmem>>, %arg10: memref<3x128x1xf32, #tpu.memory_space<vmem>>, %arg11: memref<18x128xbf16, #tpu.memory_space<vmem>>, %arg12: memref<18x1xf32, #tpu.memory_space<vmem>>, %arg13: memref<1x18x256xbf16, #tpu.memory_space<vmem>>, %arg14: memref<1x1x18x1xf32, #tpu.memory_space<vmem>>, %arg15: memref<1x1x18x1xf32, #tpu.memory_space<vmem>>) attributes {dimension_semantics = [#tpu.dimension_semantics<parallel>, #tpu.dimension_semantics<parallel>], iteration_bounds = array<i64: 2, 1>, scalar_prefetch = 0 : i64, scratch_operands = 0 : i64, tpu.core_type = #tpu.core_type<tc>, window_params = [{transform_indices = @transform_0, window_bounds = array<i64: 1, 3, 256>}, {transform_indices = @transform_1, window_bounds = array<i64: 1, 1, 256>}, {pipeline_mode = #tpu.pipeline_mode<synchronous>, transform_indices = @transform_2, window_bounds = array<i64: 18, 1>}, {pipeline_mode = #tpu.pipeline_mode<synchronous>, transform_indices = @transform_3, window_bounds = array<i64: 64, 3>}, {pipeline_mode = #tpu.pipeline_mode<synchronous>, transform_indices = @transform_4, window_bounds = array<i64: 64, 1>}, {pipeline_mode = #tpu.pipeline_mode<synchronous>, transform_indices = @transform_5, window_bounds = array<i64: 128, 64>}, {pipeline_mode = #tpu.pipeline_mode<synchronous>, transform_indices = @transform_6, window_bounds = array<i64: 128, 1>}, {pipeline_mode = #tpu.pipeline_mode<synchronous>, transform_indices = @transform_7, window_bounds = array<i64: 3, 128, 128>}, {pipeline_mode = #tpu.pipeline_mode<synchronous>, transform_indices = @transform_8, window_bounds = array<i64: 3, 128, 1>}, {pipeline_mode = #tpu.pipeline_mode<synchronous>, transform_indices = @transform_9, window_bounds = array<i64: 18, 128>}, {pipeline_mode = #tpu.pipeline_mode<synchronous>, transform_indices = @transform_10, window_bounds = array<i64: 18, 1>}, {transform_indices = @transform_11, window_bounds = array<i64: 1, 18, 256>}, {transform_indices = @transform_12, window_bounds = array<i64: 1, 1, 18, 1>}, {transform_indices = @transform_13, window_bounds = array<i64: 1, 1, 18, 1>}]} {
    %c0 = arith.constant 0 : index
    %c0_0 = arith.constant 0 : index
    %0 = vector.load %arg5[%c0, %c0_0] : memref<64x3xbf16, #tpu.memory_space<vmem>>, vector<64x3xbf16>
    %1 = arith.extf %0 : vector<64x3xbf16> to vector<64x3xf32>
    %c0_1 = arith.constant 0 : index
    %c0_2 = arith.constant 0 : index
    %2 = vector.load %arg6[%c0_1, %c0_2] : memref<64x1xf32, #tpu.memory_space<vmem>>, vector<64x1xf32>
    %c0_3 = arith.constant 0 : index
    %c0_4 = arith.constant 0 : index
    %3 = vector.load %arg7[%c0_3, %c0_4] : memref<128x64xbf16, #tpu.memory_space<vmem>>, vector<128x64xbf16>
    %c0_5 = arith.constant 0 : index
    %c0_6 = arith.constant 0 : index
    %4 = vector.load %arg8[%c0_5, %c0_6] : memref<128x1xf32, #tpu.memory_space<vmem>>, vector<128x1xf32>
    %c0_7 = arith.constant 0 : index
    %c0_8 = arith.constant 0 : index
    %c0_9 = arith.constant 0 : index
    %5 = vector.load %arg9[%c0_7, %c0_8, %c0_9] : memref<3x128x128xbf16, #tpu.memory_space<vmem>>, vector<1x128x128xbf16>
    %6 = vector.shape_cast %5 : vector<1x128x128xbf16> to vector<128x128xbf16>
    %c1 = arith.constant 1 : index
    %c0_10 = arith.constant 0 : index
    %c0_11 = arith.constant 0 : index
    %7 = vector.load %arg9[%c1, %c0_10, %c0_11] : memref<3x128x128xbf16, #tpu.memory_space<vmem>>, vector<1x128x128xbf16>
    %8 = vector.shape_cast %7 : vector<1x128x128xbf16> to vector<128x128xbf16>
    %c2 = arith.constant 2 : index
    %c0_12 = arith.constant 0 : index
    %c0_13 = arith.constant 0 : index
    %9 = vector.load %arg9[%c2, %c0_12, %c0_13] : memref<3x128x128xbf16, #tpu.memory_space<vmem>>, vector<1x128x128xbf16>
    %10 = vector.shape_cast %9 : vector<1x128x128xbf16> to vector<128x128xbf16>
    %c0_14 = arith.constant 0 : index
    %c0_15 = arith.constant 0 : index
    %c0_16 = arith.constant 0 : index
    %11 = vector.load %arg10[%c0_14, %c0_15, %c0_16] : memref<3x128x1xf32, #tpu.memory_space<vmem>>, vector<1x128x1xf32>
    %12 = vector.shape_cast %11 : vector<1x128x1xf32> to vector<128x1xf32>
    %c1_17 = arith.constant 1 : index
    %c0_18 = arith.constant 0 : index
    %c0_19 = arith.constant 0 : index
    %13 = vector.load %arg10[%c1_17, %c0_18, %c0_19] : memref<3x128x1xf32, #tpu.memory_space<vmem>>, vector<1x128x1xf32>
    %14 = vector.shape_cast %13 : vector<1x128x1xf32> to vector<128x1xf32>
    %c2_20 = arith.constant 2 : index
    %c0_21 = arith.constant 0 : index
    %c0_22 = arith.constant 0 : index
    %15 = vector.load %arg10[%c2_20, %c0_21, %c0_22] : memref<3x128x1xf32, #tpu.memory_space<vmem>>, vector<1x128x1xf32>
    %16 = vector.shape_cast %15 : vector<1x128x1xf32> to vector<128x1xf32>
    %c0_23 = arith.constant 0 : index
    %c0_24 = arith.constant 0 : index
    %17 = vector.load %arg11[%c0_23, %c0_24] : memref<18x128xbf16, #tpu.memory_space<vmem>>, vector<18x128xbf16>
    %c0_25 = arith.constant 0 : index
    %c0_26 = arith.constant 0 : index
    %18 = vector.load %arg12[%c0_25, %c0_26] : memref<18x1xf32, #tpu.memory_space<vmem>>, vector<18x1xf32>
    %c0_27 = arith.constant 0 : index
    %c0_28 = arith.constant 0 : index
    %19 = vector.load %arg4[%c0_27, %c0_28] : memref<18x1xi32, #tpu.memory_space<vmem>>, vector<18x1xi32>
    %cst = arith.constant 0.000000e+00 : f32
    %20 = vector.broadcast %cst : f32 to vector<18x1xf32>
    %cst_29 = arith.constant 0.000000e+00 : f32
    %21 = vector.broadcast %cst_29 : f32 to vector<18x1xf32>
    %c0_30 = arith.constant 0 : index
    %c0_31 = arith.constant 0 : index
    %c0_32 = arith.constant 0 : index
    %22 = vector.load %arg2[%c0_30, %c0_31, %c0_32] : memref<1x3x256xbf16, #tpu.memory_space<vmem>>, vector<1x3x256xbf16>
    %23 = vector.shape_cast %22 : vector<1x3x256xbf16> to vector<3x256xbf16>
    %24 = arith.extf %23 : vector<3x256xbf16> to vector<3x256xf32>
    %c0_33 = arith.constant 0 : index
    %c0_34 = arith.constant 0 : index
    %c0_35 = arith.constant 0 : index
    %25 = vector.load %arg3[%c0_33, %c0_34, %c0_35] : memref<1x1x256xi32, #tpu.memory_space<vmem>>, vector<1x1x256xi32>
    %26 = vector.shape_cast %25 : vector<1x1x256xi32> to vector<1x256xi32>
    %27 = vector.extract_strided_slice %1 {offsets = [0, 0], sizes = [64, 1], strides = [1, 1]} : vector<64x3xf32> to vector<64x1xf32>
    %28 = vector.extract_strided_slice %24 {offsets = [0, 0], sizes = [1, 256], strides = [1, 1]} : vector<3x256xf32> to vector<1x256xf32>
    %29 = vector.broadcast %27 : vector<64x1xf32> to vector<64x256xf32>
    %30 = vector.broadcast %28 : vector<1x256xf32> to vector<64x256xf32>
    %31 = arith.mulf %29, %30 : vector<64x256xf32>
    %32 = vector.broadcast %2 : vector<64x1xf32> to vector<64x256xf32>
    %33 = arith.addf %32, %31 : vector<64x256xf32>
    %34 = vector.extract_strided_slice %1 {offsets = [0, 1], sizes = [64, 1], strides = [1, 1]} : vector<64x3xf32> to vector<64x1xf32>
    %35 = vector.extract_strided_slice %24 {offsets = [1, 0], sizes = [1, 256], strides = [1, 1]} : vector<3x256xf32> to vector<1x256xf32>
    %36 = vector.broadcast %34 : vector<64x1xf32> to vector<64x256xf32>
    %37 = vector.broadcast %35 : vector<1x256xf32> to vector<64x256xf32>
    %38 = arith.mulf %36, %37 : vector<64x256xf32>
    %39 = arith.addf %33, %38 : vector<64x256xf32>
    %40 = vector.extract_strided_slice %1 {offsets = [0, 2], sizes = [64, 1], strides = [1, 1]} : vector<64x3xf32> to vector<64x1xf32>
    %41 = vector.extract_strided_slice %24 {offsets = [2, 0], sizes = [1, 256], strides = [1, 1]} : vector<3x256xf32> to vector<1x256xf32>
    %42 = vector.broadcast %40 : vector<64x1xf32> to vector<64x256xf32>
    %43 = vector.broadcast %41 : vector<1x256xf32> to vector<64x256xf32>
    %44 = arith.mulf %42, %43 : vector<64x256xf32>
    %45 = arith.addf %39, %44 : vector<64x256xf32>
    %cst_36 = arith.constant 0.000000e+00 : f32
    %46 = vector.broadcast %cst_36 : f32 to vector<64x256xf32>
    %47 = arith.maximumf %45, %46 : vector<64x256xf32>
    %48 = arith.truncf %47 : vector<64x256xf32> to vector<64x256xbf16>
    %cst_37 = arith.constant dense<0.000000e+00> : vector<128x256xf32>
    %49 = tpu.matmul %3, %48, %cst_37 {dimension_numbers = #tpu.dot_dimension_numbers<[1], [0], [0], [1], [0, 0, 1, 1], [], []>} : vector<128x64xbf16>, vector<64x256xbf16>, vector<128x256xf32> -> vector<128x256xf32>
    %50 = vector.broadcast %4 : vector<128x1xf32> to vector<128x256xf32>
    %51 = arith.addf %49, %50 : vector<128x256xf32>
    %cst_38 = arith.constant 0.000000e+00 : f32
    %52 = vector.broadcast %cst_38 : f32 to vector<128x256xf32>
    %53 = arith.maximumf %51, %52 : vector<128x256xf32>
    %54 = arith.truncf %53 : vector<128x256xf32> to vector<128x256xbf16>
    %cst_39 = arith.constant dense<0.000000e+00> : vector<128x256xf32>
    %55 = tpu.matmul %6, %54, %cst_39 {dimension_numbers = #tpu.dot_dimension_numbers<[1], [0], [0], [1], [0, 0, 1, 1], [], []>} : vector<128x128xbf16>, vector<128x256xbf16>, vector<128x256xf32> -> vector<128x256xf32>
    %56 = vector.broadcast %12 : vector<128x1xf32> to vector<128x256xf32>
    %57 = arith.addf %55, %56 : vector<128x256xf32>
    %cst_40 = arith.constant 0.000000e+00 : f32
    %58 = vector.broadcast %cst_40 : f32 to vector<128x256xf32>
    %59 = arith.maximumf %57, %58 : vector<128x256xf32>
    %60 = arith.truncf %59 : vector<128x256xf32> to vector<128x256xbf16>
    %cst_41 = arith.constant dense<0.000000e+00> : vector<128x256xf32>
    %61 = tpu.matmul %8, %60, %cst_41 {dimension_numbers = #tpu.dot_dimension_numbers<[1], [0], [0], [1], [0, 0, 1, 1], [], []>} : vector<128x128xbf16>, vector<128x256xbf16>, vector<128x256xf32> -> vector<128x256xf32>
    %62 = vector.broadcast %14 : vector<128x1xf32> to vector<128x256xf32>
    %63 = arith.addf %61, %62 : vector<128x256xf32>
    %cst_42 = arith.constant 0.000000e+00 : f32
    %64 = vector.broadcast %cst_42 : f32 to vector<128x256xf32>
    %65 = arith.maximumf %63, %64 : vector<128x256xf32>
    %66 = arith.truncf %65 : vector<128x256xf32> to vector<128x256xbf16>
    %cst_43 = arith.constant dense<0.000000e+00> : vector<128x256xf32>
    %67 = tpu.matmul %10, %66, %cst_43 {dimension_numbers = #tpu.dot_dimension_numbers<[1], [0], [0], [1], [0, 0, 1, 1], [], []>} : vector<128x128xbf16>, vector<128x256xbf16>, vector<128x256xf32> -> vector<128x256xf32>
    %68 = vector.broadcast %16 : vector<128x1xf32> to vector<128x256xf32>
    %69 = arith.addf %67, %68 : vector<128x256xf32>
    %cst_44 = arith.constant 0.000000e+00 : f32
    %70 = vector.broadcast %cst_44 : f32 to vector<128x256xf32>
    %71 = arith.maximumf %69, %70 : vector<128x256xf32>
    %72 = arith.truncf %71 : vector<128x256xf32> to vector<128x256xbf16>
    %cst_45 = arith.constant dense<0.000000e+00> : vector<18x256xf32>
    %73 = tpu.matmul %17, %72, %cst_45 {dimension_numbers = #tpu.dot_dimension_numbers<[1], [0], [0], [1], [0, 0, 1, 1], [], []>} : vector<18x128xbf16>, vector<128x256xbf16>, vector<18x256xf32> -> vector<18x256xf32>
    %74 = vector.broadcast %18 : vector<18x1xf32> to vector<18x256xf32>
    %75 = arith.addf %73, %74 : vector<18x256xf32>
    %76 = arith.truncf %75 : vector<18x256xf32> to vector<18x256xbf16>
    %c0_46 = arith.constant 0 : index
    %c0_47 = arith.constant 0 : index
    %c0_48 = arith.constant 0 : index
    %77 = vector.load %arg13[%c0_46, %c0_47, %c0_48] : memref<1x18x256xbf16, #tpu.memory_space<vmem>>, vector<1x18x256xbf16>
    %78 = vector.shape_cast %77 : vector<1x18x256xbf16> to vector<18x256xbf16>
    %79 = vector.shape_cast %76 : vector<18x256xbf16> to vector<1x18x256xbf16>
    tpu.vector_store %arg13[%c0_46, %c0_47, %c0_48], %79 {strides = array<i32>} : memref<1x18x256xbf16, #tpu.memory_space<vmem>>, vector<1x18x256xbf16>,
    %80 = vector.broadcast %19 : vector<18x1xi32> to vector<18x256xi32>
    %81 = vector.broadcast %26 : vector<1x256xi32> to vector<18x256xi32>
    %82 = arith.cmpi eq, %80, %81 : vector<18x256xi32>
    %83 = arith.extui %82 : vector<18x256xi1> to vector<18x256xi32>
    %84 = arith.sitofp %83 : vector<18x256xi32> to vector<18x256xf32>
    %85 = arith.mulf %84, %75 : vector<18x256xf32>
    %cst_49 = arith.constant dense<0.000000e+00> : vector<18xf32>
    %86 = vector.multi_reduction <add>, %85, %cst_49 [1] : vector<18x256xf32> to vector<18xf32>
    %87 = vector.shape_cast %86 : vector<18xf32> to vector<18x1xf32>
    %88 = arith.addf %20, %87 : vector<18x1xf32>
    %cst_50 = arith.constant dense<0.000000e+00> : vector<18xf32>
    %89 = vector.multi_reduction <add>, %84, %cst_50 [1] : vector<18x256xf32> to vector<18xf32>
    %90 = vector.shape_cast %89 : vector<18xf32> to vector<18x1xf32>
    %91 = arith.addf %21, %90 : vector<18x1xf32>
    %c0_51 = arith.constant 0 : index
    %c0_52 = arith.constant 0 : index
    %c0_53 = arith.constant 0 : index
    %c0_54 = arith.constant 0 : index
    %92 = vector.load %arg14[%c0_51, %c0_52, %c0_53, %c0_54] : memref<1x1x18x1xf32, #tpu.memory_space<vmem>>, vector<1x1x18x1xf32>
    %93 = vector.shape_cast %92 : vector<1x1x18x1xf32> to vector<18x1xf32>
    %94 = vector.shape_cast %88 : vector<18x1xf32> to vector<1x1x18x1xf32>
    tpu.vector_store %arg14[%c0_51, %c0_52, %c0_53, %c0_54], %94 {strides = array<i32>} : memref<1x1x18x1xf32, #tpu.memory_space<vmem>>, vector<1x1x18x1xf32>,
    %c0_55 = arith.constant 0 : index
    %c0_56 = arith.constant 0 : index
    %c0_57 = arith.constant 0 : index
    %c0_58 = arith.constant 0 : index
    %95 = vector.load %arg15[%c0_55, %c0_56, %c0_57, %c0_58] : memref<1x1x18x1xf32, #tpu.memory_space<vmem>>, vector<1x1x18x1xf32>
    %96 = vector.shape_cast %95 : vector<1x1x18x1xf32> to vector<18x1xf32>
    %97 = vector.shape_cast %91 : vector<18x1xf32> to vector<1x1x18x1xf32>
    tpu.vector_store %arg15[%c0_55, %c0_56, %c0_57, %c0_58], %97 {strides = array<i32>} : memref<1x1x18x1xf32, #tpu.memory_space<vmem>>, vector<1x1x18x1xf32>,
    return
  }
  func.func @transform_0(%arg0: i32, %arg1: i32) -> (i32, i32, i32) {
    %c0_i32 = arith.constant 0 : i32
    %c0_i32_0 = arith.constant 0 : i32
    return %arg0, %c0_i32, %arg1 : i32, i32, i32
  }
  func.func @transform_1(%arg0: i32, %arg1: i32) -> (i32, i32, i32) {
    %c0_i32 = arith.constant 0 : i32
    %c0_i32_0 = arith.constant 0 : i32
    return %arg0, %c0_i32, %arg1 : i32, i32, i32
  }
  func.func @transform_2(%arg0: i32, %arg1: i32) -> (i32, i32) {
    %c0_i32 = arith.constant 0 : i32
    %c0_i32_0 = arith.constant 0 : i32
    %c0_i32_1 = arith.constant 0 : i32
    return %c0_i32, %c0_i32_0 : i32, i32
  }
  func.func @transform_3(%arg0: i32, %arg1: i32) -> (i32, i32) {
    %c0_i32 = arith.constant 0 : i32
    %c0_i32_0 = arith.constant 0 : i32
    %c0_i32_1 = arith.constant 0 : i32
    return %c0_i32, %c0_i32_0 : i32, i32
  }
  func.func @transform_4(%arg0: i32, %arg1: i32) -> (i32, i32) {
    %c0_i32 = arith.constant 0 : i32
    %c0_i32_0 = arith.constant 0 : i32
    %c0_i32_1 = arith.constant 0 : i32
    return %c0_i32, %c0_i32_0 : i32, i32
  }
  func.func @transform_5(%arg0: i32, %arg1: i32) -> (i32, i32) {
    %c0_i32 = arith.constant 0 : i32
    %c0_i32_0 = arith.constant 0 : i32
    %c0_i32_1 = arith.constant 0 : i32
    return %c0_i32, %c0_i32_0 : i32, i32
  }
  func.func @transform_6(%arg0: i32, %arg1: i32) -> (i32, i32) {
    %c0_i32 = arith.constant 0 : i32
    %c0_i32_0 = arith.constant 0 : i32
    %c0_i32_1 = arith.constant 0 : i32
    return %c0_i32, %c0_i32_0 : i32, i32
  }
  func.func @transform_7(%arg0: i32, %arg1: i32) -> (i32, i32, i32) {
    %c0_i32 = arith.constant 0 : i32
    %c0_i32_0 = arith.constant 0 : i32
    %c0_i32_1 = arith.constant 0 : i32
    %c0_i32_2 = arith.constant 0 : i32
    return %c0_i32, %c0_i32_0, %c0_i32_1 : i32, i32, i32
  }
  func.func @transform_8(%arg0: i32, %arg1: i32) -> (i32, i32, i32) {
    %c0_i32 = arith.constant 0 : i32
    %c0_i32_0 = arith.constant 0 : i32
    %c0_i32_1 = arith.constant 0 : i32
    %c0_i32_2 = arith.constant 0 : i32
    return %c0_i32, %c0_i32_0, %c0_i32_1 : i32, i32, i32
  }
  func.func @transform_9(%arg0: i32, %arg1: i32) -> (i32, i32) {
    %c0_i32 = arith.constant 0 : i32
    %c0_i32_0 = arith.constant 0 : i32
    %c0_i32_1 = arith.constant 0 : i32
    return %c0_i32, %c0_i32_0 : i32, i32
  }
  func.func @transform_10(%arg0: i32, %arg1: i32) -> (i32, i32) {
    %c0_i32 = arith.constant 0 : i32
    %c0_i32_0 = arith.constant 0 : i32
    %c0_i32_1 = arith.constant 0 : i32
    return %c0_i32, %c0_i32_0 : i32, i32
  }
  func.func @transform_11(%arg0: i32, %arg1: i32) -> (i32, i32, i32) {
    %c0_i32 = arith.constant 0 : i32
    %c0_i32_0 = arith.constant 0 : i32
    return %arg0, %c0_i32, %arg1 : i32, i32, i32
  }
  func.func @transform_12(%arg0: i32, %arg1: i32) -> (i32, i32, i32, i32) {
    %c0_i32 = arith.constant 0 : i32
    %c0_i32_0 = arith.constant 0 : i32
    %c0_i32_1 = arith.constant 0 : i32
    return %arg0, %arg1, %c0_i32, %c0_i32_0 : i32, i32, i32, i32
  }
  func.func @transform_13(%arg0: i32, %arg1: i32) -> (i32, i32, i32, i32) {
    %c0_i32 = arith.constant 0 : i32
    %c0_i32_0 = arith.constant 0 : i32
    %c0_i32_1 = arith.constant 0 : i32
    return %arg0, %arg1, %c0_i32, %c0_i32_0 : i32, i32, i32, i32
  }
}

</mosaic_0001>

<bundles_post_ra>
// kernel: rotation_regression_forward.1
= control target key start
LH: loop header
LB: loop body
LE: loop exit
PB: predicated region body
PF: predicated region fallthrough
CT: control target
= control target key end

     0   :  { %s2991_s25 = smov 0   ;;  %s2993_s26 = smov 0   ;;  %s3843_s0 = inlined_call_operand.vmem [shape: bf16[2,3,256], index: 0, kind: input, shape index: {}]   ;;  %s3844_s1 = inlined_call_operand.vmem [shape: s32[2,1,256], index: 1, kind: input, shape index: {}]   ;;  %s3845_s2 = inlined_call_operand.vmem [shape: s32[18,1], index: 2, kind: input, shape index: {}]   ;;  %s3846_s3 = inlined_call_operand.vmem [shape: bf16[64,3], index: 3, kind: input, shape index: {}]   ;;  %s3847_s4 = inlined_call_operand.vmem [shape: f32[64,1], index: 4, kind: input, shape index: {}]   ;;  %s3848_s5 = inlined_call_operand.vmem [shape: bf16[128,64], index: 5, kind: input, shape index: {}]   ;;  %s3849_s6 = inlined_call_operand.vmem [shape: f32[128,1], index: 6, kind: input, shape index: {}]   ;;  %s3850_s7 = inlined_call_operand.vmem [shape: bf16[3,128,128], index: 7, kind: input, shape index: {}]   ;;  %s3851_s8 = inlined_call_operand.vmem [shape: f32[3,128,1], index: 8, kind: input, shape index: {}]   ;;  %s3852_s9 = inlined_call_operand.vmem [shape: bf16[18,128], index: 9, kind: input, shape index: {}]   ;;  %s3853_s10 = inlined_call_operand.vmem [shape: f32[18,1], index: 10, kind: input, shape index: {}]   ;;  %s3854_s11 = inlined_call_operand.vmem [shape: bf16[2,18,256], index: 11, kind: output, shape index: {0}]   ;;  %s3855_s12 = inlined_call_operand.vmem [shape: f32[2,1,18,1], index: 12, kind: output, shape index: {1}]   ;;  %s3856_s13 = inlined_call_operand.vmem [shape: f32[2,1,18,1], index: 13, kind: output, shape index: {2}]  }
   0x1   :  { %s2995_s27 = smov 0  }
   0x2 LB: > { %s36_s28 = sadd.s32 1, %s2911_s26  ;;  %p2608_p0 = scmp.ge.s32.totalorder %s2915_s27, 1  ;;  %s2915_s27 = sphi %s2995_s27, %s24_s27   ;;  %s2911_s26 = sphi %s2993_s26, %s3946_s26   ;;  %s2907_s25 = sphi %s2991_s25, %s3945_s25  }
   0x3   : > { %p38_p1 = scmp.ge.s32.totalorder %s36_s28, 2  ;;  %p433_p2 = scmp.lt.s32.totalorder %s2915_s27, 3 }
   0x5   : > { %s3948_s28 = smov (%p38_p1, %s36_s28), 0  ;;  %p434_p3 = pnand %p2608_p0, %p433_p2 }
   0x7   : > { %437 = sbr.rel (%p434_p3) target bundleno = 1706 (0x6aa), region = 64 }
   0xe   : > { %v576_v0 = vld [vmem:[%s3847_s4 + $0x8] sm:$0xff]  ;;  %v2737_v2 = vld [vmem:[%s3846_s3] sm:$0xff]   ;;  %v3857_v3 = vmov 0   ;;  %v2918_v4 = vmov 1   ;;  %v2753_v12 = vld [vmem:[%s3846_s3 + $0x10] sm:$0xff]   ;;  %v2919_v13 = vmov 2  }
   0xf   : > { %v2752_v1 = vld [vmem:[%s3846_s3 + $0x8] sm:$0xff]   ;;  %2784 = vset.pattern.permute.xlu1 %v3857_v3  ;;  %2798 = vset.pattern.permute.xlu0 %v2918_v4  ;;  %v2738_v7 = vunpack.c.l.bf16 %v2737_v2  ;;  %v2739_v8 = vunpack.c.h.bf16 %v2737_v2  ;;  %v575_v11 = vld [vmem:[%s3847_s4] sm:$0xff]  ;;  %v578_v14 = vld [vmem:[%s3847_s4 + $0x18] sm:$0xff]  ;;  %v2746_v15 = vunpack.c.l.bf16 %v2753_v12  ;;  %v2747_v16 = vunpack.c.h.bf16 %v2753_v12  ;;  %p512_p4 = scmp.lt.s32.totalorder %s2907_s25, 1 }
  0x10   : > { %v2742_v5 = vunpack.c.l.bf16 %v2752_v1  ;;  %v2743_v6 = vunpack.c.h.bf16 %v2752_v1  ;;  %809 = vperm.xlu1 %2784, %v576_v0   ;;  %1223 = vmatprep.mubr.bf16.mxu0 %v3857_v3  ;;  %v577_v18 = vld [vmem:[%s3847_s4 + $0x10] sm:$0xff]  ;;  %v2754_v19 = vld [vmem:[%s3846_s3 + $0x18] sm:$0xff]   ;;  %v579_v20 = vld [vmem:[%s3847_s4 + $0x20] sm:$0xff]  ;;  %v768_v0 = vlaneseq  ;;  %vm1166_vm0 = vcmask 523264  }
  0x11   : > { %v2786_v10 = vpack.i.bf16 %v2739_v8, %v2738_v7  ;;  %1512 = vmatprep.mubr.bf16.mxu1 %v3857_v3  ;;  %v2815_v17 = vpack.i.bf16 %v2747_v16, %v2746_v15  ;;  %v2750_v21 = vunpack.c.l.bf16 %v2754_v19  ;;  %v2751_v22 = vunpack.c.h.bf16 %v2754_v19  ;;  %v580_v24 = vld [vmem:[%s3847_s4 + $0x28] sm:$0xff]  ;;  %v581_v25 = vld [vmem:[%s3847_s4 + $0x30] sm:$0xff]  ;;  %v582_v26 = vld [vmem:[%s3847_s4 + $0x38] sm:$0xff]  ;;  %s3950_s25 = smov (!%p512_p4, %s2907_s25), 1 }
  0x12   : > { %v2799_v9 = vpack.i.bf16 %v2743_v6, %v2742_v5  ;;  %v600_v27 = vld [vmem:[%s3849_s6 + $0x8] sm:$0xff]  ;;  %v599_v28 = vld [vmem:[%s3849_s6] sm:$0xff]  ;;  %v601_v30 = vld [vmem:[%s3849_s6 + $0x10] sm:$0xff]  ;;  %s2732_s15 = sshll.u32 %s3950_s25, 2  ;;  %s2611_s14 = sshll.u32 %s3950_s25, 1  ;;  %vm2365_vm3 = vcmask 1041408  }
  0x13   : > { %v2833_v23 = vpack.i.bf16 %v2751_v22, %v2750_v21  ;;  %v603_v29 = vld [vmem:[%s3849_s6 + $0x20] sm:$0xff]  ;;  %v605_v31 = vld [vmem:[%s3849_s6 + $0x30] sm:$0xff]  ;;  %v602_v32 = vld [vmem:[%s3849_s6 + $0x18] sm:$0xff]  ;;  %s519_s22 = scalar_lea.vmem %s3843_s0, %s2732_s15  ;;  %s528_s17 = scalar_lea.vmem %s3844_s1, %s2611_s14  ;;  %vm2388_vm8 = vcmask 7168   ;;  %vm2391_vm9 = vcmask 1024  }
  0x14   : > { %2800 = vperm.xlu0 %2798, %v2799_v9   ;;  %2785 = vset.pattern.permute.xlu1 %v2918_v4  ;;  %v607_v33 = vld [vmem:[%s3849_s6 + $0x40] sm:$0xff]  ;;  %v604_v34 = vld [vmem:[%s3849_s6 + $0x28] sm:$0xff]  ;;  %v609_v35 = vld [vmem:[%s3849_s6 + $0x50] sm:$0xff]  ;;  %s3590_s18 = smul.u32 24, %s3950_s25 }
  0x15   : > { %2787 = vperm.xlu1 %2785, %v2786_v10   ;;  %v606_v36 = vld [vmem:[%s3849_s6 + $0x38] sm:$0xff]  ;;  %v611_v37 = vld [vmem:[%s3849_s6 + $0x60] sm:$0xff]  ;;  %v608_v38 = vld [vmem:[%s3849_s6 + $0x48] sm:$0xff] }
  0x16   : > { %v613_v39 = vld [vmem:[%s3849_s6 + $0x70] sm:$0xff]  ;;  %v610_v40 = vld [vmem:[%s3849_s6 + $0x58] sm:$0xff]  ;;  %v665_v41 = vld [vmem:[%s3851_s8] sm:$0xff]  ;;  %s3599_s21 = scalar_lea.vmem %s3856_s13, %s3590_s18  ;;  %s538_s14 = scalar_lea.vmem %s3854_s11, %s3590_s18 }
  0x17   : > { %v612_v42 = vld [vmem:[%s3849_s6 + $0x68] sm:$0xff]  ;;  %v667_v43 = vld [vmem:[%s3851_s8 + $0x10] sm:$0xff]  ;;  %v614_v44 = vld [vmem:[%s3849_s6 + $0x78] sm:$0xff] }
  0x18   : > { %2804 = vset.pattern.permute.xlu0 %v3857_v3  ;;  %v669_v45 = vld [vmem:[%s3851_s8 + $0x20] sm:$0xff]  ;;  %v666_v46 = vld [vmem:[%s3851_s8 + $0x8] sm:$0xff]  ;;  %v671_v47 = vld [vmem:[%s3851_s8 + $0x30] sm:$0xff] }
  0x19   : > { %2806 = vperm.xlu0 %2804, %v2786_v10   ;;  %2791 = vset.pattern.permute.xlu1 %v2919_v13  ;;  %v668_v48 = vld [vmem:[%s3851_s8 + $0x18] sm:$0xff]  ;;  %v673_v49 = vld [vmem:[%s3851_s8 + $0x40] sm:$0xff]  ;;  %v670_v50 = vld [vmem:[%s3851_s8 + $0x28] sm:$0xff] }
  0x1a   : > { %2793 = vperm.xlu1 %2791, %v2786_v10   ;;  %v675_v51 = vld [vmem:[%s3851_s8 + $0x50] sm:$0xff]  ;;  %v672_v52 = vld [vmem:[%s3851_s8 + $0x38] sm:$0xff]  ;;  %v677_v53 = vld [vmem:[%s3851_s8 + $0x60] sm:$0xff] }
  0x1b   : > { %v674_v54 = vld [vmem:[%s3851_s8 + $0x48] sm:$0xff]  ;;  %v679_v55 = vld [vmem:[%s3851_s8 + $0x70] sm:$0xff]  ;;  %v676_v56 = vld [vmem:[%s3851_s8 + $0x58] sm:$0xff] }
  0x1c   : > { %v2647_v57 = vld [vmem:[%s3851_s8 + $0x80] sm:$0xff]  ;;  %v678_v58 = vld [vmem:[%s3851_s8 + $0x68] sm:$0xff]  ;;  %v2649_v59 = vld [vmem:[%s3851_s8 + $0x90] sm:$0xff] }
  0x1d   : > { %804 = vperm.xlu0 %2804, %v575_v11   ;;  %v680_v60 = vld [vmem:[%s3851_s8 + $0x78] sm:$0xff]  ;;  %v2651_v61 = vld [vmem:[%s3851_s8 + $0xa0] sm:$0xff]  ;;  %v2648_v62 = vld [vmem:[%s3851_s8 + $0x88] sm:$0xff] }
  0x1e   : > { %2797 = vset.pattern.permute.xlu1 %v3857_v3  ;;  %v2653_v63 = vld [vmem:[%s3851_s8 + $0xb0] sm:$0xff]  ;;  %v2650_v1 = vld [vmem:[%s3851_s8 + $0x98] sm:$0xff]  ;;  %v2655_v2 = vld [vmem:[%s3851_s8 + $0xc0] sm:$0xff] }
  0x1f   : > { %819 = vperm.xlu1 %2797, %v578_v14   ;;  %v724_v5 = vld [vmem:[%s519_s22] sm:$0xf]  ;;  %v2657_v10 = vld [vmem:[%s3851_s8 + $0xd0] sm:$0xff]  ;;  %v2654_v19 = vld [vmem:[%s3851_s8 + $0xb8] sm:$0xff] }
  0x21   : > { %2811 = vperm.xlu0 %2804, %v2799_v9  }
  0x23   : > { %2816 = vperm.xlu1 %2797, %v2815_v17  }
  0x25   : > { %814 = vperm.xlu0 %2804, %v577_v18  }
  0x27   : > { %2820 = vset.pattern.permute.xlu1 %v2919_v13 }
  0x28   : > { %2822 = vperm.xlu1 %2820, %v2799_v9   ;;  %v2652_v9 = vld [vmem:[%s3851_s8 + $0xa8] sm:$0xff] }
  0x29   : > { %824 = vperm.xlu0 %2804, %v579_v20   ;;  %v2659_v20 = vld [vmem:[%s3851_s8 + $0xe0] sm:$0xff] }
  0x2c   : > { %2826 = vset.pattern.permute.xlu1 %v3857_v3 }
  0x2d   : > { %2834 = vperm.xlu0 %2804, %v2833_v23   ;;  %829 = vperm.xlu1 %2826, %v580_v24  }
  0x31   : > { %834 = vperm.xlu0 %2804, %v581_v25   ;;  %2827 = vset.pattern.permute.xlu1 %v2918_v4 }
  0x32   : > { %2829 = vperm.xlu1 %2827, %v2815_v17  }
  0x35   : > { %2845 = vset.pattern.permute.xlu0 %v2918_v4  ;;  %v769_v4 = vshrl.u32 %v768_v0, 7 }
  0x36   : > { %2847 = vperm.xlu0 %2845, %v2833_v23   ;;  %2838 = vset.pattern.permute.xlu1 %v2919_v13 }
  0x37   : > { %2840 = vperm.xlu1 %2838, %v2815_v17   ;;  %v3181_v7 = vsub.s32 0, %v769_v4  ;;  %v774_v8 = vsub.s32 4, %v769_v4  ;;  %v3189_v11 = vsub.s32 1, %v769_v4  ;;  %v896_v12 = vsub.s32 5, %v769_v4 }
  0x38   : > { %v974_v15 = vsub.s32 2, %v769_v4  ;;  %v978_v16 = vsub.s32 6, %v769_v4 }
  0x3a   : > { %2858 = vset.pattern.permute.xlu0 %v3857_v3 }
  0x3b   : > { %2844 = vset.pattern.permute.xlu1 %v3857_v3  ;;  %1053 = vperm.xlu0 %2858, %v600_v27  }
  0x3c   : > { %839 = vperm.xlu1 %2844, %v582_v26  }
  0x3f   : > { %1068 = vperm.xlu0 %2858, %v603_v29   ;;  %v2656_v29 = vld [vmem:[%s3851_s8 + $0xc8] sm:$0xff] }
  0x40   : > { %2851 = vset.pattern.permute.xlu1 %v2919_v13  ;;  %v725_v13 = vunpack.c.l.bf16 %v724_v5 }
  0x41   : > { %2853 = vperm.xlu1 %2851, %v2833_v23  }
  0x42   : > { %v771_v17 = vrot.slane %v725_v13, %v3181_v7  ;;  %v775_v18 = vrot.slane %v725_v13, %v774_v8  ;;  %v893_v21 = vrot.slane %v725_v13, %v3189_v11  ;;  %v897_v22 = vrot.slane %v725_v13, %v896_v12  ;;  %v2665_v8 = vld [vmem:[%s3851_s8 + $0x110] sm:$0xff] }
  0x43   : > { %1078 = vperm.xlu0 %2858, %v605_v31   ;;  %v975_v24 = vrot.slane %v725_v13, %v974_v15  ;;  %v979_v25 = vrot.slane %v725_v13, %v978_v16 }
  0x44   : > { %v3202_v27 = vrot.slane %v771_v17, %v3181_v7  ;;  %v3214_v31 = vrot.slane %v893_v21, %v3189_v11 }
  0x45   : > { %2857 = vset.pattern.permute.xlu1 %v3857_v3 }
  0x46   : > { %1048 = vperm.xlu1 %2857, %v599_v28   ;;  %v3205_v28 = vrot.slane %v775_v18, %v3181_v7 }
  0x47   : > { %1088 = vperm.xlu0 %2858, %v607_v33  }
  0x4a   : > { %1058 = vperm.xlu1 %2857, %v601_v30   ;;  %v2661_v30 = vld [vmem:[%s3851_s8 + $0xf0] sm:$0xff] }
  0x4b   : > { %1098 = vperm.xlu0 %2858, %v609_v35  }
  0x4e   : > { %1063 = vperm.xlu1 %2857, %v602_v32   ;;  %v3217_v32 = vrot.slane %v897_v22, %v3189_v11 }
  0x4f   : > { %1108 = vperm.xlu0 %2858, %v611_v37  }
  0x52   : > { %1073 = vperm.xlu1 %2857, %v604_v34  }
  0x53   : > { %1118 = vperm.xlu0 %2858, %v613_v39  }
  0x56   : > { %1083 = vperm.xlu1 %2857, %v606_v36  }
  0x57   : > { %1354 = vperm.xlu0 %2858, %v665_v41   ;;  %v3221_v41 = vrot.slane %v979_v25, %v974_v15  ;;  %v2662_v25 = vld [vmem:[%s3851_s8 + $0xf8] sm:$0xff] }
  0x5a   : > { %1093 = vperm.xlu1 %2857, %v608_v38  }
  0x5b   : > { %1364 = vperm.xlu0 %2858, %v667_v43  }
  0x5e   : > { %1103 = vperm.xlu1 %2857, %v610_v40   ;;  %v3219_v40 = vrot.slane %v975_v24, %v974_v15 }
  0x5f   : > { %1374 = vperm.xlu0 %2858, %v669_v45  }
  0x62   : > { %1113 = vperm.xlu1 %2857, %v612_v42  }
  0x63   : > { %1384 = vperm.xlu0 %2858, %v671_v47   ;;  %v2658_v47 = vld [vmem:[%s3851_s8 + $0xd8] sm:$0xff] }
  0x66   : > { %1123 = vperm.xlu1 %2857, %v614_v44  }
  0x67   : > { %1394 = vperm.xlu0 %2858, %v673_v49  }
  0x6a   : > { %1359 = vperm.xlu1 %2857, %v666_v46  }
  0x6b   : > { %1404 = vperm.xlu0 %2858, %v675_v51  }
  0x6e   : > { %1369 = vperm.xlu1 %2857, %v668_v48   ;;  %v2663_v48 = vld [vmem:[%s3851_s8 + $0x100] sm:$0xff] }
  0x6f   : > { %1414 = vperm.xlu0 %2858, %v677_v53  }
  0x72   : > { %1379 = vperm.xlu1 %2857, %v670_v50  }
  0x73   : > { %1424 = vperm.xlu0 %2858, %v679_v55  }
  0x76   : > { %1389 = vperm.xlu1 %2857, %v672_v52  }
  0x77   : > { %1643 = vperm.xlu0 %2858, %v2647_v57  }
  0x7a   : > { %1399 = vperm.xlu1 %2857, %v674_v54  }
  0x7b   : > { %1653 = vperm.xlu0 %2858, %v2649_v59  }
  0x7e   : > { %1409 = vperm.xlu1 %2857, %v676_v56  }
  0x7f   : > { %1663 = vperm.xlu0 %2858, %v2651_v61  }
  0x82   : > { %1419 = vperm.xlu1 %2857, %v678_v58  }
  0x83   : > { %1673 = vperm.xlu0 %2858, %v2653_v63  }
  0x86   : > { %1429 = vperm.xlu1 %2857, %v680_v60  }
  0x87   : > { %1683 = vperm.xlu0 %2858, %v2655_v2   ;;  %v2660_v2 = vld [vmem:[%s3851_s8 + $0xe8] sm:$0xff] }
  0x8a   : > { %1648 = vperm.xlu1 %2857, %v2648_v62  }
  0x8b   : > { %1693 = vperm.xlu0 %2858, %v2657_v10  }
  0x8e   : > { %1658 = vperm.xlu1 %2857, %v2650_v1  }
  0x8f   : > { %v810_v6 = vpop.permute.xlu1 %809  ;;  %1703 = vperm.xlu0 %2858, %v2659_v20  }
  0x92   : > { %1668 = vperm.xlu1 %2857, %v2652_v9  }
  0x93   : > { %v3191_v14 = vpop.permute.xlu0 %2800  ;;  %1713 = vperm.xlu0 %2858, %v2661_v30   ;;  %v2667_v30 = vld [vmem:[%s3851_s8 + $0x120] sm:$0xff] }
  0x94   : > { %v2788_v23 = vpop.permute.xlu1 %2787  ;;  %v2802_v4 = vunpack.i.l.bf16 %v3191_v14  ;;  %v2803_v20 = vunpack.i.h.bf16 %v3191_v14 }
  0x95   : > { %v2790_v33 = vunpack.i.h.bf16 %v2788_v23  ;;  %v2789_v34 = vunpack.i.l.bf16 %v2788_v23 }
  0x96   : > { %1678 = vperm.xlu1 %2857, %v2654_v19   ;;  %v912_v14 = vmul.f32 %v2802_v4, %v3214_v31 }
  0x97   : > { %v908_v49 = vmul.f32 %v2789_v34, %v3214_v31  ;;  %v909_v50 = vmul.f32 %v2789_v34, %v3217_v32  ;;  %v910_v51 = vmul.f32 %v2790_v33, %v3214_v31  ;;  %v911_v52 = vmul.f32 %v2790_v33, %v3217_v32  ;;  %1932 = vperm.xlu0 %2858, %v2663_v48  }
  0x98   : > { %v2807_v26 = vpop.permute.xlu0 %2806 }
  0x99   : > { %v2809_v35 = vunpack.i.h.bf16 %v2807_v26  ;;  %v2808_v36 = vunpack.i.l.bf16 %v2807_v26  ;;  %v2794_v37 = vpop.permute.xlu1 %2793 }
  0x9a   : > { %v2796_v38 = vunpack.i.h.bf16 %v2794_v37  ;;  %v2795_v39 = vunpack.i.l.bf16 %v2794_v37  ;;  %1688 = vperm.xlu1 %2857, %v2656_v29   ;;  %v913_v37 = vmul.f32 %v2802_v4, %v3217_v32 }
  0x9b   : > { %v788_v42 = vmul.f32 %v2809_v35, %v3202_v27  ;;  %v789_v43 = vmul.f32 %v2809_v35, %v3205_v28  ;;  %v786_v45 = vmul.f32 %v2808_v36, %v3202_v27  ;;  %v787_v46 = vmul.f32 %v2808_v36, %v3205_v28  ;;  %1942 = vperm.xlu0 %2858, %v2665_v8  }
  0x9c   : > { %v805_v44 = vpop.permute.xlu0 %804  ;;  %v990_v57 = vmul.f32 %v2795_v39, %v3219_v40  ;;  %v991_v58 = vmul.f32 %v2795_v39, %v3221_v41  ;;  %v993_v59 = vmul.f32 %v2796_v38, %v3221_v41  ;;  %v992_v9 = vmul.f32 %v2796_v38, %v3219_v40 }
  0x9d   : > { %v844_v53 = vadd.f32 %v810_v6, %v788_v42  ;;  %v845_v54 = vadd.f32 %v810_v6, %v789_v43  ;;  %v842_v55 = vadd.f32 %v805_v44, %v786_v45  ;;  %v843_v56 = vadd.f32 %v805_v44, %v787_v46  ;;  %v2664_v45 = vld [vmem:[%s3851_s8 + $0x108] sm:$0xff] }
  0x9e   : > { %v820_v60 = vpop.permute.xlu1 %819  ;;  %1698 = vperm.xlu1 %2857, %v2658_v47   ;;  %v914_v38 = vmul.f32 %v2803_v20, %v3214_v31  ;;  %v915_v39 = vmul.f32 %v2803_v20, %v3217_v32 }
  0x9f   : > { %v924_v61 = vadd.f32 %v908_v49, %v842_v55  ;;  %v925_v62 = vadd.f32 %v909_v50, %v843_v56  ;;  %v927_v0 = vadd.f32 %v911_v52, %v845_v54  ;;  %v926_v1 = vadd.f32 %v910_v51, %v844_v53  ;;  %1952 = vperm.xlu0 %2858, %v2667_v30   ;;  %v2669_v49 = vld [vmem:[%s3851_s8 + $0x130] sm:$0xff] }
  0xa0   : > { %v2812_v63 = vpop.permute.xlu0 %2811 }
  0xa1   : > { %v2814_v5 = vunpack.i.h.bf16 %v2812_v63  ;;  %v2813_v6 = vunpack.i.l.bf16 %v2812_v63  ;;  %v1007_v10 = vadd.f32 %v991_v58, %v925_v62  ;;  %v1009_v12 = vadd.f32 %v993_v59, %v927_v0  ;;  %v2666_v59 = vld [vmem:[%s3851_s8 + $0x118] sm:$0xff] }
  0xa2   : > { %v1006_v13 = vadd.f32 %v990_v57, %v924_v61  ;;  %v3250_v17 = vpop.permute.xlu1 %2816  ;;  %1708 = vperm.xlu1 %2857, %v2660_v2   ;;  %v1008_v24 = vadd.f32 %v992_v9, %v926_v1  ;;  %v2671_v1 = vld [vmem:[%s3851_s8 + $0x140] sm:$0xff] }
  0xa3   : > { %v792_v15 = vmul.f32 %v2814_v5, %v3202_v27  ;;  %v793_v16 = vmul.f32 %v2814_v5, %v3205_v28  ;;  %v790_v18 = vmul.f32 %v2813_v6, %v3202_v27  ;;  %v791_v19 = vmul.f32 %v2813_v6, %v3205_v28  ;;  %1962 = vperm.xlu0 %2858, %v2669_v49  }
  0xa4   : > { %v815_v21 = vpop.permute.xlu0 %814  ;;  %v1023_v22 = vmax.f32 %v1007_v10, 0.0  ;;  %v1025_v23 = vmax.f32 %v1009_v12, 0.0  ;;  %v1022_v36 = vmax.f32 %v1006_v13, 0.0  ;;  %v1024_v44 = vmax.f32 %v1008_v24, 0.0  ;;  %v2668_v10 = vld [vmem:[%s3851_s8 + $0x128] sm:$0xff] }
  0xa5   : > { %v848_v26 = vadd.f32 %v820_v60, %v792_v15  ;;  %v846_v29 = vadd.f32 %v815_v21, %v790_v18  ;;  %v849_v33 = vadd.f32 %v820_v60, %v793_v16  ;;  %v847_v34 = vadd.f32 %v815_v21, %v791_v19  ;;  %v2673_v16 = vld [vmem:[%s3851_s8 + $0x150] sm:$0xff] }
  0xa6   : > { %v1039_v35 = vpack.c.bf16 %v1025_v23, %v1023_v22  ;;  %1718 = vperm.xlu1 %2857, %v2662_v25   ;;  %v1038_v53 = vpack.c.bf16 %v1024_v44, %v1022_v36  ;;  %v2818_v2 = vunpack.i.l.bf16 %v3250_v17  ;;  %v2819_v12 = vunpack.i.h.bf16 %v3250_v17  ;;  %v2670_v17 = vld [vmem:[%s3851_s8 + $0x138] sm:$0xff] }
  0xa7   : > { %v2823_v43 = vpop.permute.xlu1 %2822  ;;  %v928_v46 = vadd.f32 %v912_v14, %v846_v29  ;;  %v929_v50 = vadd.f32 %v913_v37, %v847_v34  ;;  %v930_v51 = vadd.f32 %v914_v38, %v848_v26  ;;  %v931_v52 = vadd.f32 %v915_v39, %v849_v33  ;;  %1972 = vperm.xlu0 %2858, %v2671_v1   ;;  %v2675_v29 = vld [vmem:[%s3851_s8 + $0x160] sm:$0xff] }
  0xa8   : > { %1191 = vmatprep.subr.bf16.mxu0 %v1039_v35  ;;  %v825_v42 = vpop.permute.xlu0 %824  ;;  %v2825_v47 = vunpack.i.h.bf16 %v2823_v43  ;;  %v2824_v48 = vunpack.i.l.bf16 %v2823_v43  ;;  %v794_v19 = vmul.f32 %v2818_v2, %v3202_v27  ;;  %v795_v20 = vmul.f32 %v2818_v2, %v3205_v28 }
  0xa9   : > { %1192 = vmatpush1.bf16.msra.mxu0 %v1038_v53  ;;  %v796_v24 = vmul.f32 %v2819_v12, %v3202_v27  ;;  %v797_v25 = vmul.f32 %v2819_v12, %v3205_v28 }
  0xaa   : > { %v994_v54 = vmul.f32 %v2824_v48, %v3219_v40  ;;  %v995_v55 = vmul.f32 %v2824_v48, %v3221_v41  ;;  %v996_v56 = vmul.f32 %v2825_v47, %v3219_v40  ;;  %v997_v57 = vmul.f32 %v2825_v47, %v3221_v41  ;;  %1937 = vperm.xlu1 %2857, %v2664_v45  }
  0xab   : > { %1982 = vperm.xlu0 %2858, %v2673_v16   ;;  %v850_v36 = vadd.f32 %v825_v42, %v794_v19  ;;  %v851_v14 = vadd.f32 %v825_v42, %v795_v20  ;;  %v2677_v42 = vld [vmem:[%s3851_s8 + $0x170] sm:$0xff]  ;;  %v2676_v19 = vld [vmem:[%s3851_s8 + $0x168] sm:$0xff] }
  0xac   : > { %v3275_v58 = vpop.permute.xlu0 %2834  ;;  %v1010_v60 = vadd.f32 %v994_v54, %v928_v46  ;;  %v1011_v61 = vadd.f32 %v995_v55, %v929_v50  ;;  %v1012_v62 = vadd.f32 %v996_v56, %v930_v51  ;;  %v1013_v63 = vadd.f32 %v997_v57, %v931_v52  ;;  %v830_v0 = vpop.permute.xlu1 %829  ;;  %v2672_v46 = vld [vmem:[%s3851_s8 + $0x148] sm:$0xff] }
  0xad   : > { %v2836_v23 = vunpack.i.l.bf16 %v3275_v58  ;;  %v2837_v37 = vunpack.i.h.bf16 %v3275_v58  ;;  %v852_v39 = vadd.f32 %v830_v0, %v796_v24  ;;  %v853_v43 = vadd.f32 %v830_v0, %v797_v25  ;;  %v2674_v0 = vld [vmem:[%s3851_s8 + $0x158] sm:$0xff]  ;;  %v718_v25 = vld [vmem:[%s3853_s10] sm:$0xff] }
  0xae   : > { %v1027_v4 = vmax.f32 %v1011_v61, 0.0  ;;  %v1029_v5 = vmax.f32 %v1013_v63, 0.0  ;;  %v1026_v6 = vmax.f32 %v1010_v60, 0.0  ;;  %v1028_v8 = vmax.f32 %v1012_v62, 0.0  ;;  %1947 = vperm.xlu1 %2857, %v2666_v59  }
  0xaf   : > { %v798_v44 = vmul.f32 %v2836_v23, %v3202_v27  ;;  %1992 = vperm.xlu0 %2858, %v2675_v29   ;;  %v799_v47 = vmul.f32 %v2836_v23, %v3205_v28  ;;  %v800_v62 = vmul.f32 %v2837_v37, %v3202_v27  ;;  %v801_v63 = vmul.f32 %v2837_v37, %v3205_v28 }
  0xb0   : > { %v3284_v9 = vpop.permute.xlu0 %834  ;;  %v1041_v13 = vpack.c.bf16 %v1029_v5, %v1027_v4  ;;  %v1040_v15 = vpack.c.bf16 %v1028_v8, %v1026_v6  ;;  %v720_v6 = vld [vmem:[%s3853_s10 + $0x10] sm:$0x3] }
  0xb1   : > { %v2830_v18 = vpop.permute.xlu1 %2829 }
  0xb2   : > { %v2832_v21 = vunpack.i.h.bf16 %v2830_v18  ;;  %v2831_v22 = vunpack.i.l.bf16 %v2830_v18  ;;  %1193 = vmatprep.subr.bf16.mxu0 %v1041_v13  ;;  %1957 = vperm.xlu1 %2857, %v2668_v10   ;;  %v854_v18 = vadd.f32 %v3284_v9, %v798_v44 }
  0xb3   : > { %1194 = vmatpush1.bf16.msra.mxu0 %v1040_v15  ;;  %2002 = vperm.xlu0 %2858, %v2677_v42  }
  0xb4   : > { %v916_v30 = vmul.f32 %v2831_v22, %v3214_v31  ;;  %v917_v33 = vmul.f32 %v2831_v22, %v3217_v32  ;;  %v918_v34 = vmul.f32 %v2832_v21, %v3214_v31  ;;  %v919_v35 = vmul.f32 %v2832_v21, %v3217_v32 }
  0xb5   : > { %v2848_v26 = vpop.permute.xlu0 %2847 }
  0xb6   : > { %v2841_v38 = vpop.permute.xlu1 %2840  ;;  %1967 = vperm.xlu1 %2857, %v2670_v17   ;;  %v2849_v45 = vunpack.i.l.bf16 %v2848_v26  ;;  %v2850_v48 = vunpack.i.h.bf16 %v2848_v26  ;;  %v932_v51 = vadd.f32 %v916_v30, %v850_v36  ;;  %v933_v52 = vadd.f32 %v917_v33, %v851_v14  ;;  %v2678_v36 = vld [vmem:[%s3851_s8 + $0x178] sm:$0xff] }
  0xb7   : > { %v2843_v49 = vunpack.i.h.bf16 %v2841_v38  ;;  %v2842_v50 = vunpack.i.l.bf16 %v2841_v38  ;;  %v934_v53 = vadd.f32 %v918_v34, %v852_v39  ;;  %v935_v54 = vadd.f32 %v919_v35, %v853_v43  ;;  %2231 = vperm.xlu0 %2858, %v720_v6   ;;  %v2862_v6 = vld [vmem:[%s3848_s5 + $0x18] sm:$0xff]  }
  0xb8   : > { %v920_v59 = vmul.f32 %v2849_v45, %v3214_v31  ;;  %v921_v60 = vmul.f32 %v2849_v45, %v3217_v32  ;;  %v922_v8 = vmul.f32 %v2850_v48, %v3214_v31  ;;  %v923_v10 = vmul.f32 %v2850_v48, %v3217_v32  ;;  %v723_v48 = vld [vmem:[%s3845_s2 + $0x10] sm:$0x3] }
  0xb9   : > { %v998_v55 = vmul.f32 %v2842_v50, %v3219_v40  ;;  %v999_v56 = vmul.f32 %v2842_v50, %v3221_v41  ;;  %v1000_v57 = vmul.f32 %v2843_v49, %v3219_v40  ;;  %v1001_v58 = vmul.f32 %v2843_v49, %v3221_v41 }
  0xba   : > { %1977 = vperm.xlu1 %2857, %v2672_v46   ;;  %v3337_v20 = vpop.permute.xlu0 %1053  ;;  %v855_v31 = vadd.f32 %v3284_v9, %v799_v47  ;;  %v936_v23 = vadd.f32 %v920_v59, %v854_v18  ;;  %v2860_v59 = vld [vmem:[%s3848_s5 + $0x8] sm:$0xff]  }
  0xbb   : > { %v840_v61 = vpop.permute.xlu1 %839  ;;  %v1014_v1 = vadd.f32 %v998_v55, %v932_v51  ;;  %v1015_v2 = vadd.f32 %v999_v56, %v933_v52  ;;  %v1016_v4 = vadd.f32 %v1000_v57, %v934_v53  ;;  %v1017_v5 = vadd.f32 %v1001_v58, %v935_v54  ;;  %2221 = vperm.xlu0 %2858, %v718_v25   ;;  %v2859_v52 = vld [vmem:[%s3848_s5] sm:$0xff]   ;;  %v719_v53 = vld [vmem:[%s3853_s10 + $0x8] sm:$0xff] }
  0xbc   : > { %v856_v27 = vadd.f32 %v840_v61, %v800_v62  ;;  %v857_v12 = vadd.f32 %v840_v61, %v801_v63  ;;  %v937_v26 = vadd.f32 %v921_v60, %v855_v31  ;;  %v722_v56 = vld [vmem:[%s3845_s2 + $0x8] sm:$0xff] }
  0xbd   : > { %v1031_v28 = vmax.f32 %v1015_v2, 0.0  ;;  %v1033_v13 = vmax.f32 %v1017_v5, 0.0  ;;  %v1030_v15 = vmax.f32 %v1014_v1, 0.0  ;;  %v1032_v16 = vmax.f32 %v1016_v4, 0.0 }
  0xbe   : > { %1987 = vperm.xlu1 %2857, %v2674_v0   ;;  %v938_v29 = vadd.f32 %v922_v8, %v856_v27  ;;  %v939_v30 = vadd.f32 %v923_v10, %v857_v12  ;;  %v3352_v44 = vpop.permute.xlu0 %1068  ;;  %v2861_v0 = vld [vmem:[%s3848_s5 + $0x10] sm:$0xff]  }
  0xbf   : > { %v1043_v32 = vpack.c.bf16 %v1033_v13, %v1031_v28  ;;  %v1042_v22 = vpack.c.bf16 %v1032_v16, %v1030_v15  ;;  %v2863_v28 = vld [vmem:[%s3848_s5 + $0x20] sm:$0xff]  }
  0xc0   : > { %v2854_v21 = vpop.permute.xlu1 %2853 }
  0xc1   : > { %v2856_v17 = vunpack.i.h.bf16 %v2854_v21  ;;  %v2855_v24 = vunpack.i.l.bf16 %v2854_v21  ;;  %1195 = vmatprep.subr.bf16.mxu0 %v1043_v32 }
  0xc2   : > { %1997 = vperm.xlu1 %2857, %v2676_v19   ;;  %1196 = vmatpush1.bf16.msra.mxu0 %v1042_v22  ;;  %v3362_v51 = vpop.permute.xlu0 %1078  ;;  %v2864_v19 = vld [vmem:[%s3848_s5 + $0x28] sm:$0xff]  }
  0xc3   : > { %v1002_v33 = vmul.f32 %v2855_v24, %v3219_v40  ;;  %v1003_v34 = vmul.f32 %v2855_v24, %v3221_v41  ;;  %v1004_v9 = vmul.f32 %v2856_v17, %v3219_v40  ;;  %v1005_v35 = vmul.f32 %v2856_v17, %v3221_v41  ;;  %v721_v40 = vld [vmem:[%s3845_s2] sm:$0xff] }
  0xc4   : > { %2319 = vperm.xlu0 %2858, %v721_v40  }
  0xc5   : > { %v1018_v14 = vadd.f32 %v1002_v33, %v936_v23  ;;  %v1019_v37 = vadd.f32 %v1003_v34, %v937_v26  ;;  %v1020_v38 = vadd.f32 %v1004_v9, %v938_v29  ;;  %v1021_v39 = vadd.f32 %v1005_v35, %v939_v30  ;;  %v3350_v43 = vpop.permute.xlu1 %1048  ;;  %v2865_v23 = vld [vmem:[%s3848_s5 + $0x30] sm:$0xff]   ;;  %v2866_v29 = vld [vmem:[%s3848_s5 + $0x38] sm:$0xff]  }
  0xc6   : > { %2007 = vperm.xlu1 %2857, %v2678_v36   ;;  %v3372_v55 = vpop.permute.xlu0 %1088 }
  0xc7   : > { %v1035_v41 = vmax.f32 %v1019_v37, 0.0  ;;  %v1037_v45 = vmax.f32 %v1021_v39, 0.0  ;;  %v1034_v46 = vmax.f32 %v1018_v14, 0.0  ;;  %v1036_v47 = vmax.f32 %v1020_v38, 0.0 }
  0xc9   : > { %v1045_v49 = vpack.c.bf16 %v1037_v45, %v1035_v41  ;;  %v1044_v50 = vpack.c.bf16 %v1036_v47, %v1034_v46  ;;  %v3360_v42 = vpop.permute.xlu1 %1058 }
  0xca   : > { %2325 = vperm.xlu1 %2857, %v723_v48   ;;  %v3381_v58 = vpop.permute.xlu0 %1098 }
  0xcb   : > { %1197 = vmatprep.subr.bf16.mxu0 %v1045_v49 }
  0xcc   : > { %1198 = vmatpush1.bf16.msra.mxu0 %v1044_v50 }
  0xcd   : > { %v3370_v54 = vpop.permute.xlu1 %1063 }
  0xce   : > { %2226 = vperm.xlu1 %2857, %v719_v53   ;;  %v3388_v61 = vpop.permute.xlu0 %1108 }
  0xcf   : > { %2687 = vmatmul.mubr.msk.bf16.vlgmr.msra.gmra.mrb[0].mxu0 %vm1166_vm0, %v2859_v52 }
  0xd0   : > { %1233 = vmatprep.mubr.bf16.mxu0 %v3857_v3 }
  0xd1   : > { %v3379_v57 = vpop.permute.xlu1 %1073 }
  0xd2   : > { %2322 = vperm.xlu1 %2857, %v722_v56   ;;  %v3394_v63 = vpop.permute.xlu0 %1118 }
  0xd5   : > { %v3386_v60 = vpop.permute.xlu1 %1083 }
  0xd6   : > { %v3401_v2 = vpop.permute.xlu0 %1354 }
  0xd7   : > { %2688 = vmatmul.mubr.msk.bf16.gmra.mrb[4].mxu0 %vm1166_vm0, %v2860_v59 }
  0xd8   : > { %1243 = vmatprep.mubr.bf16.mxu0 %v3857_v3 }
  0xd9   : > { %v3392_v62 = vpop.permute.xlu1 %1093 }
  0xda   : > { %v3407_v5 = vpop.permute.xlu0 %1364 }
  0xdd   : > { %v3399_v1 = vpop.permute.xlu1 %1103 }
  0xde   : > { %v3414_v10 = vpop.permute.xlu0 %1374 }
  0xdf   : > { %2689 = vmatmul.mubr.msk.bf16.gmra.mrb[8].mxu0 %vm1166_vm0, %v2861_v0 }
  0xe0   : > { %1253 = vmatprep.mubr.bf16.mxu0 %v3857_v3 }
  0xe1   : > { %v3405_v4 = vpop.permute.xlu1 %1113 }
  0xe2   : > { %v3420_v12 = vpop.permute.xlu0 %1384 }
  0xe5   : > { %v3412_v8 = vpop.permute.xlu1 %1123 }
  0xe6   : > { %v3427_v15 = vpop.permute.xlu0 %1394 }
  0xe7   : > { %2690 = vmatmul.mubr.msk.bf16.gmra.mrb[12].mxu0 %vm1166_vm0, %v2862_v6 }
  0xe8   : > { %1263 = vmatprep.mubr.bf16.mxu0 %v3857_v3 }
  0xe9   : > { %v3418_v27 = vpop.permute.xlu1 %1359 }
  0xea   : > { %v3433_v18 = vpop.permute.xlu0 %1404 }
  0xed   : > { %v3425_v13 = vpop.permute.xlu1 %1369 }
  0xee   : > { %v3440_v21 = vpop.permute.xlu0 %1414 }
  0xef   : > { %2691 = vmatmul.mubr.msk.bf16.gmra.mrb[16].mxu0 %vm1166_vm0, %v2863_v28 }
  0xf0   : > { %1273 = vmatprep.mubr.bf16.mxu0 %v3857_v3 }
  0xf1   : > { %v3431_v16 = vpop.permute.xlu1 %1379 }
  0xf2   : > { %v3446_v22 = vpop.permute.xlu0 %1424 }
  0xf5   : > { %v3438_v31 = vpop.permute.xlu1 %1389 }
  0xf6   : > { %v3453_v24 = vpop.permute.xlu0 %1643 }
  0xf7   : > { %2692 = vmatmul.mubr.msk.bf16.gmra.mrb[20].mxu0 %vm1166_vm0, %v2864_v19 }
  0xf8   : > { %1283 = vmatprep.mubr.bf16.mxu0 %v3857_v3 }
  0xf9   : > { %v3444_v32 = vpop.permute.xlu1 %1399 }
  0xfa   : > { %v3459_v26 = vpop.permute.xlu0 %1653 }
  0xfd   : > { %v3451_v17 = vpop.permute.xlu1 %1409 }
  0xfe   : > { %v3466_v33 = vpop.permute.xlu0 %1663 }
  0xff   : > { %2693 = vmatmul.mubr.msk.bf16.gmra.mrb[24].mxu0 %vm1166_vm0, %v2865_v23 }
 0x100   : > { %1293 = vmatprep.mubr.bf16.mxu0 %v3857_v3 }
 0x101   : > { %v3457_v25 = vpop.permute.xlu1 %1419 }
 0x102   : > { %v3472_v9 = vpop.permute.xlu0 %1673 }
 0x105   : > { %v3464_v30 = vpop.permute.xlu1 %1429 }
 0x106   : > { %v3476_v36 = vpop.permute.xlu0 %1683 }
 0x107   : > { %2694 = vmatmul.mubr.msk.bf16.gmra.mrb[28].mxu0 %vm1166_vm0, %v2866_v29 }
 0x108   : > { %1801 = vmatprep.mubr.bf16.mxu0 %v3857_v3 }
 0x109   : > { %v3470_v34 = vpop.permute.xlu1 %1648 }
 0x10a   : > { %v3480_v37 = vpop.permute.xlu0 %1693 }
 0x10d   : > { %v3474_v35 = vpop.permute.xlu1 %1658 }
 0x10e   : > { %v3484_v39 = vpop.permute.xlu0 %1703 }
 0x111   : > { %v3478_v14 = vpop.permute.xlu1 %1668 }
 0x112   : > { %v3488_v41 = vpop.permute.xlu0 %1713 }
 0x113   : > { %3886 = vst [vmem:[#allocation2_spill] sm:$0xff] %v3488_v41 }
 0x115   : > { %v3482_v38 = vpop.permute.xlu1 %1678 }
 0x116   : > { %v3492_v46 = vpop.permute.xlu0 %1932 }
 0x117   : > { %3887 = vst [vmem:[#allocation3_spill] sm:$0xff] %v3492_v46 }
 0x119   : > { %v3486_v40 = vpop.permute.xlu1 %1688 }
 0x11a   : > { %v3496_v48 = vpop.permute.xlu0 %1942 }
 0x11b   : > { %3888 = vst [vmem:[#allocation4_spill] sm:$0xff] %v3496_v48 }
 0x11d   : > { %v3490_v45 = vpop.permute.xlu1 %1698 }
 0x11e   : > { %v3500_v50 = vpop.permute.xlu0 %1952 }
 0x11f   : > { %3890 = vst [vmem:[#allocation6_spill] sm:$0xff] %v3500_v50 }
 0x121   : > { %v3494_v47 = vpop.permute.xlu1 %1708 }
 0x122   : > { %v3504_v53 = vpop.permute.xlu0 %1962 }
 0x123   : > { %3892 = vst [vmem:[#allocation8_spill] sm:$0xff] %v3504_v53 }
 0x125   : > { %v3498_v49 = vpop.permute.xlu1 %1718 }
 0x126   : > { %3889 = vst [vmem:[#allocation5_spill] sm:$0xff] %v3498_v49  ;;  %v3508_v59 = vpop.permute.xlu0 %1972 }
 0x127   : > { %3894 = vst [vmem:[#allocation10_spill] sm:$0xff] %v3508_v59 }
 0x129   : > { %v3502_v52 = vpop.permute.xlu1 %1937 }
 0x12a   : > { %3891 = vst [vmem:[#allocation7_spill] sm:$0xff] %v3502_v52  ;;  %v3512_v6 = vpop.permute.xlu0 %1982 }
 0x12b   : > { %3896 = vst [vmem:[#allocation12_spill] sm:$0xff] %v3512_v6  ;;  %v726_v6 = vld [vmem:[%s528_s17] sm:$0x3]  ;;  %s548_s17 = scalar_lea.vmem %s3855_s12, %s3590_s18 }
 0x12d   : > { %v3506_v56 = vpop.permute.xlu1 %1947 }
 0x12e   : > { %3893 = vst [vmem:[#allocation9_spill] sm:$0xff] %v3506_v56  ;;  %v3516_v19 = vpop.permute.xlu0 %1992 }
 0x12f   : > { %3898 = vst [vmem:[#allocation14_spill] sm:$0xff] %v3516_v19  ;;  %v2330_v19 = vrot.slane %v726_v6, %v3181_v7 }
 0x131   : > { %v3510_v0 = vpop.permute.xlu1 %1957 }
 0x132   : > { %3895 = vst [vmem:[#allocation11_spill] sm:$0xff] %v3510_v0  ;;  %v3520_v29 = vpop.permute.xlu0 %2002 }
 0x133   : > { %3900 = vst [vmem:[#allocation16_spill] sm:$0xff] %v3520_v29  ;;  %v2334_v29 = vrot.slane %v726_v6, %v3189_v11 }
 0x135   : > { %v3514_v28 = vpop.permute.xlu1 %1967 }
 0x136   : > { %3897 = vst [vmem:[#allocation13_spill] sm:$0xff] %v3514_v28  ;;  %v3525_v53 = vpop.permute.xlu0 %2231 }
 0x137   : > { %3902 = vst [vmem:[#allocation18_spill] sm:$0xff] %v3525_v53  ;;  %v2920_v53 = vmov 0.0  }
 0x139   : > { %v3518_v23 = vpop.permute.xlu1 %1977 }
 0x13a   : > { %3899 = vst [vmem:[#allocation15_spill] sm:$0xff] %v3518_v23  ;;  %v3532_v0 = vpop.permute.xlu0 %2221 }
 0x13b   : > { %3904 = vst [vmem:[#allocation20_spill] sm:$0xff] %v3532_v0 }
 0x13d   : > { %v3522_v3 = vpop.permute.xlu1 %1987 }
 0x13e   : > { %3901 = vst [vmem:[#allocation17_spill] sm:$0xff] %v3522_v3 }
 0x141   : > { %v3530_v59 = vpop.permute.xlu1 %1997 }
 0x142   : > { %3903 = vst [vmem:[#allocation19_spill] sm:$0xff] %v3530_v59 }
 0x143   : > { %v2320_v23 = vpop.permute.xlu0 %2319 }
 0x144   : > { %vm2335_vm1 = vcmp.eq.s32.totalorder %v2320_v23, %v2330_v19  ;;  %vm2336_vm2 = vcmp.eq.s32.totalorder %v2320_v23, %v2334_v29 }
 0x145   : > { %v3534_v28 = vpop.permute.xlu1 %2007  ;;  %v3538_v50 = vsel %vm2335_vm1, 1.0, %v2920_v53  ;;  %v3540_v56 = vsel %vm2336_vm2, 1.0, %v2920_v53 }
 0x146   : > { %3905 = vst [vmem:[#allocation21_spill] sm:$0xff] %v3534_v28  ;;  %3906 = vst [vmem:[#allocation22_spill] sm:$0xff] %v3538_v50  ;;  %v2374_v0 = vadd.f32 %v3540_v56, %v3538_v50 }
 0x147   : > { %3907 = vst [vmem:[#allocation23_spill] sm:$0xff] %v3540_v56 }
 0x148   : > { %2375 = vadd.xlane.f32.xlu0 %v2374_v0 }
 0x149   : > { %v2326_v3 = vpop.permute.xlu1 %2325 }
 0x14a   : > { %vm2339_vm4 = vcmp.eq.s32.totalorder %v2326_v3, %v2330_v19  ;;  %vm2340_vm5 = vcmp.eq.s32.totalorder %v2326_v3, %v2334_v29 }
 0x14b   : > { %v3544_v28 = vsel %vm2339_vm4, 1.0, %v2920_v53  ;;  %v3546_v7 = vsel %vm2340_vm5, 1.0, %v2920_v53 }
 0x14c   : > { %3908 = vst [vmem:[#allocation24_spill] sm:$0xff] %v3544_v28  ;;  %3909 = vst [vmem:[#allocation25_spill] sm:$0xff] %v3546_v7  ;;  %v2380_v11 = vsel %vm2365_vm3, %v3544_v28, 0.0  ;;  %v2381_v6 = vsel %vm2365_vm3, %v3546_v7, 0.0 }
 0x14d   : > { %v3552_v23 = vpop.permute.xlu1 %2226  ;;  %v3554_v59 = vadd.f32 %v2381_v6, %v2380_v11 }
 0x14e   : > { %3910 = vst [vmem:[#allocation26_spill] sm:$0xff] %v3552_v23 }
 0x14f   : > { %3911 = vst [vmem:[#allocation27_spill] sm:$0xff] %v3554_v59 }
 0x151   : > { %v2323_v48 = vpop.permute.xlu1 %2322 }
 0x152   : > { %vm2337_vm6 = vcmp.eq.s32.totalorder %v2323_v48, %v2330_v19  ;;  %vm2338_vm7 = vcmp.eq.s32.totalorder %v2323_v48, %v2334_v29 }
 0x153   : > { %v3556_v3 = vsel %vm2337_vm6, 1.0, %v2920_v53  ;;  %v3558_v56 = vsel %vm2338_vm7, 1.0, %v2920_v53 }
 0x154   : > { %3912 = vst [vmem:[#allocation28_spill] sm:$0xff] %v3556_v3  ;;  %3913 = vst [vmem:[#allocation29_spill] sm:$0xff] %v3558_v56  ;;  %v3562_v0 = vadd.f32 %v3558_v56, %v3556_v3 }
 0x156   : > { %3914 = vst [vmem:[#allocation30_spill] sm:$0xff] %v3562_v0 }
 0x1a2   : > { %v1225_v50 = vpop.f32.mrb[0].mxu0 }
 0x1a3   : > { %v1226_v28 = vadd.f32 %v1225_v50, %v3350_v43  ;;  %v1227_v52 = vpop.f32.mrb[1].mxu0 }
 0x1a4   : > { %v1228_v7 = vadd.f32 %v1227_v52, %v3350_v43  ;;  %v1229_v23 = vpop.f32.mrb[2].mxu0 }
 0x1a5   : > { %v1230_v11 = vadd.f32 %v1229_v23, %v3337_v20  ;;  %v1231_v6 = vpop.f32.mrb[3].mxu0  ;;  %v1304_v19 = vmax.f32 %v1226_v28, 0.0 }
 0x1a6   : > { %v1232_v48 = vadd.f32 %v1231_v6, %v3337_v20  ;;  %v1305_v53 = vmax.f32 %v1228_v7, 0.0 }
 0x1a7   : > { %v1306_v29 = vmax.f32 %v1230_v11, 0.0 }
 0x1a8   : > { %v1307_v59 = vmax.f32 %v1232_v48, 0.0 }
 0x1a9   : > { %v1336_v46 = vpack.c.bf16 %v1306_v29, %v1304_v19 }
 0x1aa   : > { %v1235_v49 = vpop.f32.mrb[4].mxu0  ;;  %v1337_v56 = vpack.c.bf16 %v1307_v59, %v1305_v53 }
 0x1ab   : > { %v1236_v0 = vadd.f32 %v1235_v49, %v3360_v42  ;;  %v1237_v3 = vpop.f32.mrb[5].mxu0 }
 0x1ac   : > { %v1238_v50 = vadd.f32 %v1237_v3, %v3360_v42  ;;  %v1239_v41 = vpop.f32.mrb[6].mxu0  ;;  %1480 = vmatprep.subr.bf16.mxu1 %v1337_v56 }
 0x1ad   : > { %v1240_v43 = vadd.f32 %v1239_v41, %v3370_v54  ;;  %v1241_v52 = vpop.f32.mrb[7].mxu0  ;;  %1481 = vmatpush1.bf16.msra.mxu1 %v1336_v46  ;;  %v1308_v28 = vmax.f32 %v1236_v0, 0.0 }
 0x1ae   : > { %v1242_v20 = vadd.f32 %v1241_v52, %v3370_v54  ;;  %v1309_v7 = vmax.f32 %v1238_v50, 0.0 }
 0x1af   : > { %v1310_v23 = vmax.f32 %v1240_v43, 0.0 }
 0x1b0   : > { %v1311_v11 = vmax.f32 %v1242_v20, 0.0 }
 0x1b1   : > { %v1338_v6 = vpack.c.bf16 %v1310_v23, %v1308_v28 }
 0x1b2   : > { %v1339_v48 = vpack.c.bf16 %v1311_v11, %v1309_v7  ;;  %v1245_v59 = vpop.f32.mrb[8].mxu0 }
 0x1b3   : > { %v1246_v49 = vadd.f32 %v1245_v59, %v3352_v44  ;;  %v1247_v19 = vpop.f32.mrb[9].mxu0 }
 0x1b4   : > { %v1248_v42 = vadd.f32 %v1247_v19, %v3352_v44  ;;  %v1249_v3 = vpop.f32.mrb[10].mxu0  ;;  %1482 = vmatprep.subr.bf16.mxu1 %v1339_v48 }
 0x1b5   : > { %v1250_v41 = vadd.f32 %v1249_v3, %v3379_v57  ;;  %v1251_v56 = vpop.f32.mrb[11].mxu0  ;;  %1483 = vmatpush1.bf16.msra.mxu1 %v1338_v6  ;;  %v1312_v46 = vmax.f32 %v1246_v49, 0.0 }
 0x1b6   : > { %v1252_v54 = vadd.f32 %v1251_v56, %v3379_v57  ;;  %v1313_v29 = vmax.f32 %v1248_v42, 0.0 }
 0x1b7   : > { %v1314_v0 = vmax.f32 %v1250_v41, 0.0 }
 0x1b8   : > { %v1315_v53 = vmax.f32 %v1252_v54, 0.0 }
 0x1b9   : > { %v1340_v50 = vpack.c.bf16 %v1314_v0, %v1312_v46 }
 0x1ba   : > { %v1341_v43 = vpack.c.bf16 %v1315_v53, %v1313_v29  ;;  %v1255_v52 = vpop.f32.mrb[12].mxu0 }
 0x1bb   : > { %v1256_v20 = vadd.f32 %v1255_v52, %v3362_v51  ;;  %v1257_v28 = vpop.f32.mrb[13].mxu0 }
 0x1bc   : > { %v1258_v44 = vadd.f32 %v1257_v28, %v3362_v51  ;;  %v1259_v23 = vpop.f32.mrb[14].mxu0  ;;  %1484 = vmatprep.subr.bf16.mxu1 %v1341_v43 }
 0x1bd   : > { %v1260_v7 = vadd.f32 %v1259_v23, %v3386_v60  ;;  %v1261_v11 = vpop.f32.mrb[15].mxu0  ;;  %1485 = vmatpush1.bf16.msra.mxu1 %v1340_v50  ;;  %v1316_v6 = vmax.f32 %v1256_v20, 0.0 }
 0x1be   : > { %v1262_v57 = vadd.f32 %v1261_v11, %v3386_v60  ;;  %v1317_v59 = vmax.f32 %v1258_v44, 0.0 }
 0x1bf   : > { %v1318_v48 = vmax.f32 %v1260_v7, 0.0 }
 0x1c0   : > { %v1319_v49 = vmax.f32 %v1262_v57, 0.0 }
 0x1c1   : > { %v1342_v19 = vpack.c.bf16 %v1318_v48, %v1316_v6 }
 0x1c2   : > { %v1343_v42 = vpack.c.bf16 %v1319_v49, %v1317_v59  ;;  %v1265_v3 = vpop.f32.mrb[16].mxu0 }
 0x1c3   : > { %v1266_v41 = vadd.f32 %v1265_v3, %v3372_v55  ;;  %v1267_v56 = vpop.f32.mrb[17].mxu0 }
 0x1c4   : > { %v1268_v51 = vadd.f32 %v1267_v56, %v3372_v55  ;;  %v1269_v54 = vpop.f32.mrb[18].mxu0  ;;  %1486 = vmatprep.subr.bf16.mxu1 %v1343_v42 }
 0x1c5   : > { %v1270_v46 = vadd.f32 %v1269_v54, %v3392_v62  ;;  %v1271_v0 = vpop.f32.mrb[19].mxu0  ;;  %1487 = vmatpush1.bf16.msra.mxu1 %v1342_v19  ;;  %v1320_v29 = vmax.f32 %v1266_v41, 0.0 }
 0x1c6   : > { %v1272_v60 = vadd.f32 %v1271_v0, %v3392_v62  ;;  %v1321_v50 = vmax.f32 %v1268_v51, 0.0 }
 0x1c7   : > { %v1322_v53 = vmax.f32 %v1270_v46, 0.0 }
 0x1c8   : > { %v1323_v43 = vmax.f32 %v1272_v60, 0.0 }
 0x1c9   : > { %v1344_v52 = vpack.c.bf16 %v1322_v53, %v1320_v29 }
 0x1ca   : > { %v1345_v20 = vpack.c.bf16 %v1323_v43, %v1321_v50  ;;  %v1275_v28 = vpop.f32.mrb[20].mxu0 }
 0x1cb   : > { %v1276_v44 = vadd.f32 %v1275_v28, %v3381_v58  ;;  %v1277_v23 = vpop.f32.mrb[21].mxu0 }
 0x1cc   : > { %v1278_v55 = vadd.f32 %v1277_v23, %v3381_v58  ;;  %v1279_v7 = vpop.f32.mrb[22].mxu0  ;;  %1488 = vmatprep.subr.bf16.mxu1 %v1345_v20 }
 0x1cd   : > { %v1280_v11 = vadd.f32 %v1279_v7, %v3399_v1  ;;  %v1281_v57 = vpop.f32.mrb[23].mxu0  ;;  %1489 = vmatpush1.bf16.msra.mxu1 %v1344_v52  ;;  %v1324_v6 = vmax.f32 %v1276_v44, 0.0 }
 0x1ce   : > { %v1282_v62 = vadd.f32 %v1281_v57, %v3399_v1  ;;  %v1325_v59 = vmax.f32 %v1278_v55, 0.0 }
 0x1cf   : > { %v1326_v48 = vmax.f32 %v1280_v11, 0.0 }
 0x1d0   : > { %v1327_v49 = vmax.f32 %v1282_v62, 0.0 }
 0x1d1   : > { %v1346_v19 = vpack.c.bf16 %v1326_v48, %v1324_v6 }
 0x1d2   : > { %v1347_v42 = vpack.c.bf16 %v1327_v49, %v1325_v59  ;;  %v1285_v3 = vpop.f32.mrb[24].mxu0  ;;  %v2867_v49 = vld [vmem:[%s3850_s7] sm:$0xff]  }
 0x1d3   : > { %v1286_v41 = vadd.f32 %v1285_v3, %v3388_v61  ;;  %v1287_v56 = vpop.f32.mrb[25].mxu0  ;;  %v2871_v3 = vld [vmem:[%s3850_s7 + $0x20] sm:$0xff]  }
 0x1d4   : > { %v1288_v58 = vadd.f32 %v1287_v56, %v3388_v61  ;;  %v1289_v51 = vpop.f32.mrb[26].mxu0  ;;  %1490 = vmatprep.subr.bf16.mxu1 %v1347_v42  ;;  %v2870_v42 = vld [vmem:[%s3850_s7 + $0x18] sm:$0xff]   ;;  %v2873_v56 = vld [vmem:[%s3850_s7 + $0x30] sm:$0xff]  }
 0x1d5   : > { %v1290_v54 = vadd.f32 %v1289_v51, %v3405_v4  ;;  %v1291_v1 = vpop.f32.mrb[27].mxu0  ;;  %1491 = vmatpush1.bf16.msra.mxu1 %v1346_v19  ;;  %v1328_v0 = vmax.f32 %v1286_v41, 0.0  ;;  %v2376_v50 = vpop.xlane.xlu0 %2375  ;;  %v2868_v19 = vld [vmem:[%s3850_s7 + $0x8] sm:$0xff]  }
 0x1d6   : > { %v1292_v46 = vadd.f32 %v1291_v1, %v3405_v4  ;;  %v1329_v29 = vmax.f32 %v1288_v58, 0.0  ;;  %2393 = vst.msk [vmem:[%s3599_s21] sm:$0xff] %vm2388_vm8, %v2376_v50  ;;  %v2872_v41 = vld [vmem:[%s3850_s7 + $0x28] sm:$0xff]   ;;  %v2874_v58 = vld [vmem:[%s3850_s7 + $0x38] sm:$0xff]  }
 0x1d7   : > { %v1330_v60 = vmax.f32 %v1290_v54, 0.0 }
 0x1d8   : > { %v1331_v53 = vmax.f32 %v1292_v46, 0.0 }
 0x1d9   : > { %v1348_v61 = vpack.c.bf16 %v1330_v60, %v1328_v0 }
 0x1da   : > { %v1349_v43 = vpack.c.bf16 %v1331_v53, %v1329_v29  ;;  %v1295_v52 = vpop.f32.mrb[28].mxu0 }
 0x1db   : > { %v1296_v20 = vadd.f32 %v1295_v52, %v3394_v63  ;;  %v1297_v4 = vpop.f32.mrb[29].mxu0 }
 0x1dc   : > { %v1298_v28 = vadd.f32 %v1297_v4, %v3394_v63  ;;  %v1299_v44 = vpop.f32.mrb[30].mxu0  ;;  %1492 = vmatprep.subr.bf16.mxu1 %v1349_v43  ;;  %v3915_v63 = vmov 0  }
 0x1dd   : > { %v1300_v23 = vadd.f32 %v1299_v44, %v3412_v8  ;;  %v1301_v55 = vpop.f32.mrb[31].mxu0  ;;  %1493 = vmatpush1.bf16.msra.mxu1 %v1348_v61  ;;  %v1332_v11 = vmax.f32 %v1296_v20, 0.0 }
 0x1de   : > { %v1302_v7 = vadd.f32 %v1301_v55, %v3412_v8  ;;  %v1333_v62 = vmax.f32 %v1298_v28, 0.0  ;;  %v2869_v8 = vld [vmem:[%s3850_s7 + $0x10] sm:$0xff]  }
 0x1df   : > { %v1334_v57 = vmax.f32 %v1300_v23, 0.0 }
 0x1e0   : > { %v1335_v6 = vmax.f32 %v1302_v7, 0.0 }
 0x1e1   : > { %v1350_v48 = vpack.c.bf16 %v1334_v57, %v1332_v11 }
 0x1e2   : > { %v1351_v59 = vpack.c.bf16 %v1335_v6, %v1333_v62 }
 0x1e4   : > { %1494 = vmatprep.subr.bf16.mxu1 %v1351_v59 }
 0x1e5   : > { %1495 = vmatpush1.bf16.msra.mxu1 %v1350_v48 }
 0x1e8   : > { %1513 = vmatmul.mubr.bf16.vlgmr.msra.gmra.mrb[0].mxu1 %v2867_v49 }
 0x1e9   : > { %1522 = vmatprep.mubr.bf16.mxu1 %v3915_v63 }
 0x1f0   : > { %1523 = vmatmul.mubr.bf16.gmra.mrb[4].mxu1 %v2868_v19 }
 0x1f1   : > { %1532 = vmatprep.mubr.bf16.mxu1 %v3915_v63 }
 0x1f8   : > { %1533 = vmatmul.mubr.bf16.gmra.mrb[8].mxu1 %v2869_v8 }
 0x1f9   : > { %1542 = vmatprep.mubr.bf16.mxu1 %v3915_v63 }
 0x200   : > { %1543 = vmatmul.mubr.bf16.gmra.mrb[12].mxu1 %v2870_v42 }
 0x201   : > { %1552 = vmatprep.mubr.bf16.mxu1 %v3915_v63 }
 0x208   : > { %1553 = vmatmul.mubr.bf16.gmra.mrb[16].mxu1 %v2871_v3 }
 0x209   : > { %1562 = vmatprep.mubr.bf16.mxu1 %v3915_v63 }
 0x210   : > { %1563 = vmatmul.mubr.bf16.gmra.mrb[20].mxu1 %v2872_v41 }
 0x211   : > { %1572 = vmatprep.mubr.bf16.mxu1 %v3915_v63 }
 0x218   : > { %1573 = vmatmul.mubr.bf16.gmra.mrb[24].mxu1 %v2873_v56 }
 0x219   : > { %1582 = vmatprep.mubr.bf16.mxu1 %v3915_v63 }
 0x220   : > { %1583 = vmatmul.mubr.bf16.gmra.mrb[28].mxu1 %v2874_v58 }
 0x221   : > { %2090 = vmatprep.mubr.bf16.mxu1 %v3915_v63 }
 0x2bb   : > { %v1514_v51 = vpop.f32.mrb[0].mxu1 }
 0x2bc   : > { %v1515_v54 = vadd.f32 %v1514_v51, %v3401_v2  ;;  %v1516_v1 = vpop.f32.mrb[1].mxu1 }
 0x2bd   : > { %v1517_v46 = vadd.f32 %v1516_v1, %v3401_v2  ;;  %v1518_v0 = vpop.f32.mrb[2].mxu1 }
 0x2be   : > { %v1519_v60 = vadd.f32 %v1518_v0, %v3418_v27  ;;  %v1520_v29 = vpop.f32.mrb[3].mxu1  ;;  %v1593_v61 = vmax.f32 %v1515_v54, 0.0 }
 0x2bf   : > { %v1521_v53 = vadd.f32 %v1520_v29, %v3418_v27  ;;  %v1594_v43 = vmax.f32 %v1517_v46, 0.0 }
 0x2c0   : > { %v1595_v50 = vmax.f32 %v1519_v60, 0.0 }
 0x2c1   : > { %v1596_v52 = vmax.f32 %v1521_v53, 0.0 }
 0x2c2   : > { %v1625_v20 = vpack.c.bf16 %v1595_v50, %v1593_v61 }
 0x2c3   : > { %v1626_v4 = vpack.c.bf16 %v1596_v52, %v1594_v43  ;;  %v1524_v28 = vpop.f32.mrb[4].mxu1 }
 0x2c4   : > { %v1525_v44 = vadd.f32 %v1524_v28, %v3407_v5  ;;  %v1526_v23 = vpop.f32.mrb[5].mxu1 }
 0x2c5   : > { %v1527_v55 = vadd.f32 %v1526_v23, %v3407_v5  ;;  %v1528_v7 = vpop.f32.mrb[6].mxu1  ;;  %1769 = vmatprep.subr.bf16.mxu0 %v1626_v4 }
 0x2c6   : > { %v1529_v2 = vadd.f32 %v1528_v7, %v3425_v13  ;;  %v1530_v11 = vpop.f32.mrb[7].mxu1  ;;  %1770 = vmatpush1.bf16.msra.mxu0 %v1625_v20  ;;  %v1597_v57 = vmax.f32 %v1525_v44, 0.0 }
 0x2c7   : > { %v1531_v27 = vadd.f32 %v1530_v11, %v3425_v13  ;;  %v1598_v6 = vmax.f32 %v1527_v55, 0.0 }
 0x2c8   : > { %v1599_v62 = vmax.f32 %v1529_v2, 0.0 }
 0x2c9   : > { %v1600_v48 = vmax.f32 %v1531_v27, 0.0 }
 0x2ca   : > { %v1627_v59 = vpack.c.bf16 %v1599_v62, %v1597_v57 }
 0x2cb   : > { %v1628_v49 = vpack.c.bf16 %v1600_v48, %v1598_v6  ;;  %v1534_v19 = vpop.f32.mrb[8].mxu1 }
 0x2cc   : > { %v1535_v8 = vadd.f32 %v1534_v19, %v3414_v10  ;;  %v1536_v42 = vpop.f32.mrb[9].mxu1 }
 0x2cd   : > { %v1537_v5 = vadd.f32 %v1536_v42, %v3414_v10  ;;  %v1538_v3 = vpop.f32.mrb[10].mxu1  ;;  %1771 = vmatprep.subr.bf16.mxu0 %v1628_v49 }
 0x2ce   : > { %v1539_v41 = vadd.f32 %v1538_v3, %v3431_v16  ;;  %v1540_v56 = vpop.f32.mrb[11].mxu1  ;;  %1772 = vmatpush1.bf16.msra.mxu0 %v1627_v59  ;;  %v1601_v58 = vmax.f32 %v1535_v8, 0.0 }
 0x2cf   : > { %v1541_v13 = vadd.f32 %v1540_v56, %v3431_v16  ;;  %v1602_v54 = vmax.f32 %v1537_v5, 0.0 }
 0x2d0   : > { %v1603_v51 = vmax.f32 %v1539_v41, 0.0 }
 0x2d1   : > { %v1604_v1 = vmax.f32 %v1541_v13, 0.0 }
 0x2d2   : > { %v1629_v46 = vpack.c.bf16 %v1603_v51, %v1601_v58 }
 0x2d3   : > { %v1630_v0 = vpack.c.bf16 %v1604_v1, %v1602_v54  ;;  %v1544_v60 = vpop.f32.mrb[12].mxu1 }
 0x2d4   : > { %v1545_v29 = vadd.f32 %v1544_v60, %v3420_v12  ;;  %v1546_v53 = vpop.f32.mrb[13].mxu1 }
 0x2d5   : > { %v1547_v10 = vadd.f32 %v1546_v53, %v3420_v12  ;;  %v1548_v61 = vpop.f32.mrb[14].mxu1  ;;  %1773 = vmatprep.subr.bf16.mxu0 %v1630_v0 }
 0x2d6   : > { %v1549_v50 = vadd.f32 %v1548_v61, %v3438_v31  ;;  %v1550_v43 = vpop.f32.mrb[15].mxu1  ;;  %1774 = vmatpush1.bf16.msra.mxu0 %v1629_v46  ;;  %v1605_v52 = vmax.f32 %v1545_v29, 0.0 }
 0x2d7   : > { %v1551_v16 = vadd.f32 %v1550_v43, %v3438_v31  ;;  %v1606_v4 = vmax.f32 %v1547_v10, 0.0 }
 0x2d8   : > { %v1607_v20 = vmax.f32 %v1549_v50, 0.0 }
 0x2d9   : > { %v1608_v28 = vmax.f32 %v1551_v16, 0.0 }
 0x2da   : > { %v1631_v44 = vpack.c.bf16 %v1607_v20, %v1605_v52 }
 0x2db   : > { %v1632_v23 = vpack.c.bf16 %v1608_v28, %v1606_v4  ;;  %v1554_v55 = vpop.f32.mrb[16].mxu1 }
 0x2dc   : > { %v1555_v7 = vadd.f32 %v1554_v55, %v3427_v15  ;;  %v1556_v2 = vpop.f32.mrb[17].mxu1 }
 0x2dd   : > { %v1557_v12 = vadd.f32 %v1556_v2, %v3427_v15  ;;  %v1558_v11 = vpop.f32.mrb[18].mxu1  ;;  %1775 = vmatprep.subr.bf16.mxu0 %v1632_v23 }
 0x2de   : > { %v1559_v27 = vadd.f32 %v1558_v11, %v3444_v32  ;;  %v1560_v57 = vpop.f32.mrb[19].mxu1  ;;  %1776 = vmatpush1.bf16.msra.mxu0 %v1631_v44  ;;  %v1609_v62 = vmax.f32 %v1555_v7, 0.0 }
 0x2df   : > { %v1561_v31 = vadd.f32 %v1560_v57, %v3444_v32  ;;  %v1610_v48 = vmax.f32 %v1557_v12, 0.0 }
 0x2e0   : > { %v1611_v6 = vmax.f32 %v1559_v27, 0.0 }
 0x2e1   : > { %v1612_v59 = vmax.f32 %v1561_v31, 0.0 }
 0x2e2   : > { %v1633_v49 = vpack.c.bf16 %v1611_v6, %v1609_v62  ;;  %v2875_v6 = vld [vmem:[%s3850_s7 + $0x40] sm:$0xff]  }
 0x2e3   : > { %v1634_v19 = vpack.c.bf16 %v1612_v59, %v1610_v48  ;;  %v1564_v8 = vpop.f32.mrb[20].mxu1  ;;  %v2878_v48 = vld [vmem:[%s3850_s7 + $0x58] sm:$0xff]   ;;  %v2879_v59 = vld [vmem:[%s3850_s7 + $0x60] sm:$0xff]  }
 0x2e4   : > { %v1565_v42 = vadd.f32 %v1564_v8, %v3433_v18  ;;  %v1566_v5 = vpop.f32.mrb[21].mxu1  ;;  %v2882_v8 = vld [vmem:[%s3850_s7 + $0x78] sm:$0xff]  }
 0x2e5   : > { %v1567_v15 = vadd.f32 %v1566_v5, %v3433_v18  ;;  %v1568_v3 = vpop.f32.mrb[22].mxu1  ;;  %1777 = vmatprep.subr.bf16.mxu0 %v1634_v19  ;;  %v2881_v19 = vld [vmem:[%s3850_s7 + $0x70] sm:$0xff]  }
 0x2e6   : > { %v1569_v41 = vadd.f32 %v1568_v3, %v3451_v17  ;;  %v1570_v56 = vpop.f32.mrb[23].mxu1  ;;  %1778 = vmatpush1.bf16.msra.mxu0 %v1633_v49  ;;  %v1613_v13 = vmax.f32 %v1565_v42, 0.0  ;;  %v2880_v49 = vld [vmem:[%s3850_s7 + $0x68] sm:$0xff]  }
 0x2e7   : > { %v1571_v32 = vadd.f32 %v1570_v56, %v3451_v17  ;;  %v1614_v51 = vmax.f32 %v1567_v15, 0.0 }
 0x2e8   : > { %v1615_v58 = vmax.f32 %v1569_v41, 0.0 }
 0x2e9   : > { %v1616_v54 = vmax.f32 %v1571_v32, 0.0 }
 0x2ea   : > { %v1635_v1 = vpack.c.bf16 %v1615_v58, %v1613_v13 }
 0x2eb   : > { %v1636_v46 = vpack.c.bf16 %v1616_v54, %v1614_v51  ;;  %v1574_v0 = vpop.f32.mrb[24].mxu1 }
 0x2ec   : > { %v1575_v60 = vadd.f32 %v1574_v0, %v3440_v21  ;;  %v1576_v29 = vpop.f32.mrb[25].mxu1 }
 0x2ed   : > { %v1577_v18 = vadd.f32 %v1576_v29, %v3440_v21  ;;  %v1578_v53 = vpop.f32.mrb[26].mxu1  ;;  %1779 = vmatprep.subr.bf16.mxu0 %v1636_v46 }
 0x2ee   : > { %v1579_v10 = vadd.f32 %v1578_v53, %v3457_v25  ;;  %v1580_v61 = vpop.f32.mrb[27].mxu1  ;;  %1780 = vmatpush1.bf16.msra.mxu0 %v1635_v1  ;;  %v1617_v50 = vmax.f32 %v1575_v60, 0.0 }
 0x2ef   : > { %v1581_v17 = vadd.f32 %v1580_v61, %v3457_v25  ;;  %v1618_v16 = vmax.f32 %v1577_v18, 0.0 }
 0x2f0   : > { %v1619_v43 = vmax.f32 %v1579_v10, 0.0 }
 0x2f1   : > { %v1620_v52 = vmax.f32 %v1581_v17, 0.0 }
 0x2f2   : > { %v1637_v20 = vpack.c.bf16 %v1619_v43, %v1617_v50 }
 0x2f3   : > { %v1638_v4 = vpack.c.bf16 %v1620_v52, %v1618_v16  ;;  %v1584_v28 = vpop.f32.mrb[28].mxu1 }
 0x2f4   : > { %v1585_v44 = vadd.f32 %v1584_v28, %v3446_v22  ;;  %v1586_v23 = vpop.f32.mrb[29].mxu1 }
 0x2f5   : > { %v1587_v21 = vadd.f32 %v1586_v23, %v3446_v22  ;;  %v1588_v55 = vpop.f32.mrb[30].mxu1  ;;  %1781 = vmatprep.subr.bf16.mxu0 %v1638_v4  ;;  %v2876_v22 = vld [vmem:[%s3850_s7 + $0x48] sm:$0xff]  }
 0x2f6   : > { %v1589_v7 = vadd.f32 %v1588_v55, %v3464_v30  ;;  %v1590_v2 = vpop.f32.mrb[31].mxu1  ;;  %1782 = vmatpush1.bf16.msra.mxu0 %v1637_v20  ;;  %v1621_v12 = vmax.f32 %v1585_v44, 0.0 }
 0x2f7   : > { %v1591_v25 = vadd.f32 %v1590_v2, %v3464_v30  ;;  %v1622_v27 = vmax.f32 %v1587_v21, 0.0  ;;  %v2877_v30 = vld [vmem:[%s3850_s7 + $0x50] sm:$0xff]  }
 0x2f8   : > { %v1623_v11 = vmax.f32 %v1589_v7, 0.0 }
 0x2f9   : > { %v1624_v57 = vmax.f32 %v1591_v25, 0.0 }
 0x2fa   : > { %v1639_v31 = vpack.c.bf16 %v1623_v11, %v1621_v12 }
 0x2fb   : > { %v1640_v62 = vpack.c.bf16 %v1624_v57, %v1622_v27 }
 0x2fd   : > { %1783 = vmatprep.subr.bf16.mxu0 %v1640_v62 }
 0x2fe   : > { %1784 = vmatpush1.bf16.msra.mxu0 %v1639_v31 }
 0x301   : > { %1802 = vmatmul.mubr.bf16.vlgmr.msra.gmra.mrb[32].mxu0 %v2875_v6 }
 0x302   : > { %1811 = vmatprep.mubr.bf16.mxu0 %v3915_v63 }
 0x309   : > { %1812 = vmatmul.mubr.bf16.gmra.mrb[36].mxu0 %v2876_v22 }
 0x30a   : > { %1821 = vmatprep.mubr.bf16.mxu0 %v3915_v63 }
 0x311   : > { %1822 = vmatmul.mubr.bf16.gmra.mrb[40].mxu0 %v2877_v30 }
 0x312   : > { %1831 = vmatprep.mubr.bf16.mxu0 %v3915_v63 }
 0x319   : > { %1832 = vmatmul.mubr.bf16.gmra.mrb[44].mxu0 %v2878_v48 }
 0x31a   : > { %1841 = vmatprep.mubr.bf16.mxu0 %v3915_v63 }
 0x321   : > { %1842 = vmatmul.mubr.bf16.gmra.mrb[48].mxu0 %v2879_v59 }
 0x322   : > { %1851 = vmatprep.mubr.bf16.mxu0 %v3915_v63 }
 0x329   : > { %1852 = vmatmul.mubr.bf16.gmra.mrb[52].mxu0 %v2880_v49 }
 0x32a   : > { %1861 = vmatprep.mubr.bf16.mxu0 %v3915_v63 }
 0x331   : > { %1862 = vmatmul.mubr.bf16.gmra.mrb[56].mxu0 %v2881_v19 }
 0x332   : > { %1871 = vmatprep.mubr.bf16.mxu0 %v3915_v63 }
 0x339   : > { %1872 = vmatmul.mubr.bf16.gmra.mrb[60].mxu0 %v2882_v8 }
 0x33a   : > { %2276 = vmatprep.mubr.bf16.mxu0 %v3915_v63 }
 0x3d4   : > { %v1803_v42 = vpop.f32.mrb[32].mxu0 }
 0x3d5   : > { %v1804_v5 = vadd.f32 %v1803_v42, %v3453_v24  ;;  %v1805_v15 = vpop.f32.mrb[33].mxu0 }
 0x3d6   : > { %v1806_v3 = vadd.f32 %v1805_v15, %v3453_v24  ;;  %v1807_v41 = vpop.f32.mrb[34].mxu0 }
 0x3d7   : > { %v1808_v56 = vadd.f32 %v1807_v41, %v3470_v34  ;;  %v1809_v32 = vpop.f32.mrb[35].mxu0  ;;  %v1882_v58 = vmax.f32 %v1804_v5, 0.0 }
 0x3d8   : > { %v1810_v13 = vadd.f32 %v1809_v32, %v3470_v34  ;;  %v1883_v54 = vmax.f32 %v1806_v3, 0.0 }
 0x3d9   : > { %v1884_v51 = vmax.f32 %v1808_v56, 0.0 }
 0x3da   : > { %v1885_v1 = vmax.f32 %v1810_v13, 0.0 }
 0x3db   : > { %v1914_v46 = vpack.c.bf16 %v1884_v51, %v1882_v58 }
 0x3dc   : > { %v1915_v0 = vpack.c.bf16 %v1885_v1, %v1883_v54  ;;  %v1813_v60 = vpop.f32.mrb[36].mxu0 }
 0x3dd   : > { %v1814_v29 = vadd.f32 %v1813_v60, %v3459_v26  ;;  %v1815_v18 = vpop.f32.mrb[37].mxu0 }
 0x3de   : > { %v1816_v53 = vadd.f32 %v1815_v18, %v3459_v26  ;;  %v1817_v10 = vpop.f32.mrb[38].mxu0  ;;  %2058 = vmatprep.subr.bf16.mxu1 %v1915_v0 }
 0x3df   : > { %v1818_v24 = vadd.f32 %v1817_v10, %v3474_v35  ;;  %v1819_v61 = vpop.f32.mrb[39].mxu0  ;;  %2059 = vmatpush1.bf16.msra.mxu1 %v1914_v46  ;;  %v1886_v17 = vmax.f32 %v1814_v29, 0.0 }
 0x3e0   : > { %v1820_v34 = vadd.f32 %v1819_v61, %v3474_v35  ;;  %v1887_v43 = vmax.f32 %v1816_v53, 0.0 }
 0x3e1   : > { %v1888_v50 = vmax.f32 %v1818_v24, 0.0 }
 0x3e2   : > { %v1889_v16 = vmax.f32 %v1820_v34, 0.0 }
 0x3e3   : > { %v1916_v52 = vpack.c.bf16 %v1888_v50, %v1886_v17 }
 0x3e4   : > { %v1917_v20 = vpack.c.bf16 %v1889_v16, %v1887_v43  ;;  %v1823_v4 = vpop.f32.mrb[40].mxu0 }
 0x3e5   : > { %v1824_v28 = vadd.f32 %v1823_v4, %v3466_v33  ;;  %v1825_v44 = vpop.f32.mrb[41].mxu0 }
 0x3e6   : > { %v1826_v26 = vadd.f32 %v1825_v44, %v3466_v33  ;;  %v1827_v23 = vpop.f32.mrb[42].mxu0  ;;  %2060 = vmatprep.subr.bf16.mxu1 %v1917_v20 }
 0x3e7   : > { %v1828_v21 = vadd.f32 %v1827_v23, %v3478_v14  ;;  %v1829_v55 = vpop.f32.mrb[43].mxu0  ;;  %2061 = vmatpush1.bf16.msra.mxu1 %v1916_v52  ;;  %v1890_v7 = vmax.f32 %v1824_v28, 0.0 }
 0x3e8   : > { %v1830_v35 = vadd.f32 %v1829_v55, %v3478_v14  ;;  %v1891_v25 = vmax.f32 %v1826_v26, 0.0 }
 0x3e9   : > { %v1892_v2 = vmax.f32 %v1828_v21, 0.0 }
 0x3ea   : > { %v1893_v12 = vmax.f32 %v1830_v35, 0.0 }
 0x3eb   : > { %v1918_v11 = vpack.c.bf16 %v1892_v2, %v1890_v7 }
 0x3ec   : > { %v1919_v27 = vpack.c.bf16 %v1893_v12, %v1891_v25  ;;  %v1833_v57 = vpop.f32.mrb[44].mxu0  ;;  %v3916_v25 = vld [vmem:[#allocation2_spill] sm:$0xff] }
 0x3ed   : > { %v1834_v31 = vadd.f32 %v1833_v57, %v3472_v9  ;;  %v1835_v62 = vpop.f32.mrb[45].mxu0  ;;  %v3917_v57 = vld [vmem:[#allocation5_spill] sm:$0xff] }
 0x3ee   : > { %v1836_v33 = vadd.f32 %v1835_v62, %v3472_v9  ;;  %v1837_v6 = vpop.f32.mrb[46].mxu0  ;;  %2062 = vmatprep.subr.bf16.mxu1 %v1919_v27 }
 0x3ef   : > { %v1838_v22 = vadd.f32 %v1837_v6, %v3482_v38  ;;  %v1839_v30 = vpop.f32.mrb[47].mxu0  ;;  %2063 = vmatpush1.bf16.msra.mxu1 %v1918_v11  ;;  %v1894_v48 = vmax.f32 %v1834_v31, 0.0 }
 0x3f0   : > { %v1840_v14 = vadd.f32 %v1839_v30, %v3482_v38  ;;  %v1895_v49 = vmax.f32 %v1836_v33, 0.0 }
 0x3f1   : > { %v1896_v59 = vmax.f32 %v1838_v22, 0.0 }
 0x3f2   : > { %v1897_v19 = vmax.f32 %v1840_v14, 0.0 }
 0x3f3   : > { %v1920_v8 = vpack.c.bf16 %v1896_v59, %v1894_v48  ;;  %v2883_v59 = vld [vmem:[%s3850_s7 + $0x80] sm:$0xff]  }
 0x3f4   : > { %v1921_v42 = vpack.c.bf16 %v1897_v19, %v1895_v49  ;;  %v1843_v5 = vpop.f32.mrb[48].mxu0  ;;  %v2884_v49 = vld [vmem:[%s3850_s7 + $0x88] sm:$0xff]   ;;  %v2885_v19 = vld [vmem:[%s3850_s7 + $0x90] sm:$0xff]  }
 0x3f5   : > { %v1844_v15 = vadd.f32 %v1843_v5, %v3476_v36  ;;  %v1845_v3 = vpop.f32.mrb[49].mxu0  ;;  %v2888_v5 = vld [vmem:[%s3850_s7 + $0xa8] sm:$0xff]  }
 0x3f6   : > { %v1846_v9 = vadd.f32 %v1845_v3, %v3476_v36  ;;  %v1847_v41 = vpop.f32.mrb[50].mxu0  ;;  %2064 = vmatprep.subr.bf16.mxu1 %v1921_v42  ;;  %v2887_v42 = vld [vmem:[%s3850_s7 + $0xa0] sm:$0xff]   ;;  %v2890_v3 = vld [vmem:[%s3850_s7 + $0xb8] sm:$0xff]  }
 0x3f7   : > { %v1848_v56 = vadd.f32 %v1847_v41, %v3486_v40  ;;  %v1849_v32 = vpop.f32.mrb[51].mxu0  ;;  %2065 = vmatpush1.bf16.msra.mxu1 %v1920_v8  ;;  %v1898_v13 = vmax.f32 %v1844_v15, 0.0  ;;  %v2886_v8 = vld [vmem:[%s3850_s7 + $0x98] sm:$0xff]   ;;  %v2889_v15 = vld [vmem:[%s3850_s7 + $0xb0] sm:$0xff]   ;;  %v3918_v41 = vld [vmem:[#allocation3_spill] sm:$0xff] }
 0x3f8   : > { %v1850_v38 = vadd.f32 %v1849_v32, %v3486_v40  ;;  %v1899_v51 = vmax.f32 %v1846_v9, 0.0 }
 0x3f9   : > { %v1900_v58 = vmax.f32 %v1848_v56, 0.0 }
 0x3fa   : > { %v1901_v54 = vmax.f32 %v1850_v38, 0.0 }
 0x3fb   : > { %v1922_v1 = vpack.c.bf16 %v1900_v58, %v1898_v13  ;;  %v3919_v58 = vld [vmem:[#allocation7_spill] sm:$0xff] }
 0x3fc   : > { %v1923_v46 = vpack.c.bf16 %v1901_v54, %v1899_v51  ;;  %v1853_v0 = vpop.f32.mrb[52].mxu0 }
 0x3fd   : > { %v1854_v60 = vadd.f32 %v1853_v0, %v3480_v37  ;;  %v1855_v29 = vpop.f32.mrb[53].mxu0 }
 0x3fe   : > { %v1856_v36 = vadd.f32 %v1855_v29, %v3480_v37  ;;  %v1857_v18 = vpop.f32.mrb[54].mxu0  ;;  %2066 = vmatprep.subr.bf16.mxu1 %v1923_v46 }
 0x3ff   : > { %v1858_v53 = vadd.f32 %v1857_v18, %v3490_v45  ;;  %v1859_v10 = vpop.f32.mrb[55].mxu0  ;;  %2067 = vmatpush1.bf16.msra.mxu1 %v1922_v1  ;;  %v1902_v24 = vmax.f32 %v1854_v60, 0.0 }
 0x400   : > { %v1860_v40 = vadd.f32 %v1859_v10, %v3490_v45  ;;  %v1903_v34 = vmax.f32 %v1856_v36, 0.0  ;;  %v3920_v10 = vld [vmem:[#allocation4_spill] sm:$0xff] }
 0x401   : > { %v1904_v61 = vmax.f32 %v1858_v53, 0.0 }
 0x402   : > { %v1905_v17 = vmax.f32 %v1860_v40, 0.0 }
 0x403   : > { %v1924_v50 = vpack.c.bf16 %v1904_v61, %v1902_v24 }
 0x404   : > { %v1925_v43 = vpack.c.bf16 %v1905_v17, %v1903_v34  ;;  %v1863_v16 = vpop.f32.mrb[56].mxu0  ;;  %v3921_v17 = vld [vmem:[#allocation9_spill] sm:$0xff] }
 0x405   : > { %v1864_v52 = vadd.f32 %v1863_v16, %v3484_v39  ;;  %v1865_v20 = vpop.f32.mrb[57].mxu0 }
 0x406   : > { %v1866_v37 = vadd.f32 %v1865_v20, %v3484_v39  ;;  %v1867_v4 = vpop.f32.mrb[58].mxu0  ;;  %2068 = vmatprep.subr.bf16.mxu1 %v1925_v43 }
 0x407   : > { %v1868_v28 = vadd.f32 %v1867_v4, %v3494_v47  ;;  %v1869_v44 = vpop.f32.mrb[59].mxu0  ;;  %2069 = vmatpush1.bf16.msra.mxu1 %v1924_v50  ;;  %v1906_v26 = vmax.f32 %v1864_v52, 0.0 }
 0x408   : > { %v1870_v45 = vadd.f32 %v1869_v44, %v3494_v47  ;;  %v1907_v21 = vmax.f32 %v1866_v37, 0.0 }
 0x409   : > { %v1908_v23 = vmax.f32 %v1868_v28, 0.0 }
 0x40a   : > { %v1909_v55 = vmax.f32 %v1870_v45, 0.0 }
 0x40b   : > { %v1926_v35 = vpack.c.bf16 %v1908_v23, %v1906_v26  ;;  %v3922_v26 = vld [vmem:[#allocation6_spill] sm:$0xff] }
 0x40c   : > { %v1927_v7 = vpack.c.bf16 %v1909_v55, %v1907_v21  ;;  %v1873_v2 = vpop.f32.mrb[60].mxu0 }
 0x40d   : > { %v1874_v12 = vadd.f32 %v1873_v2, %v3916_v25  ;;  %v1875_v11 = vpop.f32.mrb[61].mxu0 }
 0x40e   : > { %v1876_v39 = vadd.f32 %v1875_v11, %v3916_v25  ;;  %v1877_v27 = vpop.f32.mrb[62].mxu0  ;;  %2070 = vmatprep.subr.bf16.mxu1 %v1927_v7  ;;  %v3923_v7 = vld [vmem:[#allocation11_spill] sm:$0xff] }
 0x40f   : > { %v1878_v31 = vadd.f32 %v1877_v27, %v3917_v57  ;;  %v1879_v62 = vpop.f32.mrb[63].mxu0  ;;  %2071 = vmatpush1.bf16.msra.mxu1 %v1926_v35  ;;  %v1910_v33 = vmax.f32 %v1874_v12, 0.0 }
 0x410   : > { %v1880_v47 = vadd.f32 %v1879_v62, %v3917_v57  ;;  %v1911_v22 = vmax.f32 %v1876_v39, 0.0 }
 0x411   : > { %v1912_v6 = vmax.f32 %v1878_v31, 0.0 }
 0x412   : > { %v1913_v30 = vmax.f32 %v1880_v47, 0.0 }
 0x413   : > { %v1928_v14 = vpack.c.bf16 %v1912_v6, %v1910_v33  ;;  %v3924_v33 = vld [vmem:[#allocation8_spill] sm:$0xff] }
 0x414   : > { %v1929_v48 = vpack.c.bf16 %v1913_v30, %v1911_v22 }
 0x416   : > { %2072 = vmatprep.subr.bf16.mxu1 %v1929_v48  ;;  %v3925_v48 = vld [vmem:[#allocation13_spill] sm:$0xff] }
 0x417   : > { %2073 = vmatpush1.bf16.msra.mxu1 %v1928_v14 }
 0x41a   : > { %2091 = vmatmul.mubr.bf16.vlgmr.msra.gmra.mrb[32].mxu1 %v2883_v59 }
 0x41b   : > { %2100 = vmatprep.mubr.bf16.mxu1 %v3915_v63 }
 0x422   : > { %2101 = vmatmul.mubr.bf16.gmra.mrb[36].mxu1 %v2884_v49 }
 0x423   : > { %2110 = vmatprep.mubr.bf16.mxu1 %v3915_v63 }
 0x42a   : > { %2111 = vmatmul.mubr.bf16.gmra.mrb[40].mxu1 %v2885_v19 }
 0x42b   : > { %2120 = vmatprep.mubr.bf16.mxu1 %v3915_v63 }
 0x432   : > { %2121 = vmatmul.mubr.bf16.gmra.mrb[44].mxu1 %v2886_v8 }
 0x433   : > { %2130 = vmatprep.mubr.bf16.mxu1 %v3915_v63 }
 0x43a   : > { %2131 = vmatmul.mubr.bf16.gmra.mrb[48].mxu1 %v2887_v42 }
 0x43b   : > { %2140 = vmatprep.mubr.bf16.mxu1 %v3915_v63 }
 0x442   : > { %2141 = vmatmul.mubr.bf16.gmra.mrb[52].mxu1 %v2888_v5 }
 0x443   : > { %2150 = vmatprep.mubr.bf16.mxu1 %v3915_v63 }
 0x44a   : > { %2151 = vmatmul.mubr.bf16.gmra.mrb[56].mxu1 %v2889_v15 }
 0x44b   : > { %2160 = vmatprep.mubr.bf16.mxu1 %v3915_v63 }
 0x452   : > { %2161 = vmatmul.mubr.bf16.gmra.mrb[60].mxu1 %v2890_v3 }
 0x4ed   : > { %v2092_v9 = vpop.f32.mrb[32].mxu1 }
 0x4ee   : > { %v2093_v56 = vadd.f32 %v2092_v9, %v3918_v41  ;;  %v2094_v32 = vpop.f32.mrb[33].mxu1 }
 0x4ef   : > { %v2095_v38 = vadd.f32 %v2094_v32, %v3918_v41  ;;  %v2096_v13 = vpop.f32.mrb[34].mxu1 }
 0x4f0   : > { %v2097_v51 = vadd.f32 %v2096_v13, %v3919_v58  ;;  %v2098_v54 = vpop.f32.mrb[35].mxu1  ;;  %v2171_v46 = vmax.f32 %v2093_v56, 0.0  ;;  %v3926_v56 = vld [vmem:[#allocation10_spill] sm:$0xff] }
 0x4f1   : > { %v2099_v1 = vadd.f32 %v2098_v54, %v3919_v58  ;;  %v2172_v60 = vmax.f32 %v2095_v38, 0.0 }
 0x4f2   : > { %v2173_v0 = vmax.f32 %v2097_v51, 0.0  ;;  %v3927_v51 = vld [vmem:[#allocation15_spill] sm:$0xff] }
 0x4f3   : > { %v2174_v29 = vmax.f32 %v2099_v1, 0.0 }
 0x4f4   : > { %v2203_v36 = vpack.c.bf16 %v2173_v0, %v2171_v46 }
 0x4f5   : > { %v2204_v18 = vpack.c.bf16 %v2174_v29, %v2172_v60  ;;  %v2102_v53 = vpop.f32.mrb[36].mxu1 }
 0x4f6   : > { %v2103_v40 = vadd.f32 %v2102_v53, %v3920_v10  ;;  %v2104_v24 = vpop.f32.mrb[37].mxu1 }
 0x4f7   : > { %v2105_v61 = vadd.f32 %v2104_v24, %v3920_v10  ;;  %v2106_v34 = vpop.f32.mrb[38].mxu1  ;;  %2244 = vmatprep.subr.bf16.mxu0 %v2204_v18 }
 0x4f8   : > { %v2107_v50 = vadd.f32 %v2106_v34, %v3921_v17  ;;  %v2108_v43 = vpop.f32.mrb[39].mxu1  ;;  %2245 = vmatpush1.bf16.msra.mxu0 %v2203_v36  ;;  %v2175_v52 = vmax.f32 %v2103_v40, 0.0  ;;  %v3928_v40 = vld [vmem:[#allocation12_spill] sm:$0xff] }
 0x4f9   : > { %v2109_v16 = vadd.f32 %v2108_v43, %v3921_v17  ;;  %v2176_v37 = vmax.f32 %v2105_v61, 0.0 }
 0x4fa   : > { %v2177_v20 = vmax.f32 %v2107_v50, 0.0  ;;  %v3929_v50 = vld [vmem:[#allocation17_spill] sm:$0xff] }
 0x4fb   : > { %v2178_v4 = vmax.f32 %v2109_v16, 0.0 }
 0x4fc   : > { %v2205_v28 = vpack.c.bf16 %v2177_v20, %v2175_v52 }
 0x4fd   : > { %v2206_v44 = vpack.c.bf16 %v2178_v4, %v2176_v37  ;;  %v2112_v45 = vpop.f32.mrb[40].mxu1 }
 0x4fe   : > { %v2113_v23 = vadd.f32 %v2112_v45, %v3922_v26  ;;  %v2114_v21 = vpop.f32.mrb[41].mxu1 }
 0x4ff   : > { %v2115_v55 = vadd.f32 %v2114_v21, %v3922_v26  ;;  %v2116_v35 = vpop.f32.mrb[42].mxu1  ;;  %2246 = vmatprep.subr.bf16.mxu0 %v2206_v44 }
 0x500   : > { %v2117_v2 = vadd.f32 %v2116_v35, %v3923_v7  ;;  %v2118_v25 = vpop.f32.mrb[43].mxu1  ;;  %2247 = vmatpush1.bf16.msra.mxu0 %v2205_v28  ;;  %v2179_v11 = vmax.f32 %v2113_v23, 0.0  ;;  %v3930_v23 = vld [vmem:[#allocation14_spill] sm:$0xff] }
 0x501   : > { %v2119_v12 = vadd.f32 %v2118_v25, %v3923_v7  ;;  %v2180_v27 = vmax.f32 %v2115_v55, 0.0 }
 0x502   : > { %v2181_v39 = vmax.f32 %v2117_v2, 0.0  ;;  %v3931_v2 = vld [vmem:[#allocation19_spill] sm:$0xff] }
 0x503   : > { %v2182_v57 = vmax.f32 %v2119_v12, 0.0 }
 0x504   : > { %v2207_v31 = vpack.c.bf16 %v2181_v39, %v2179_v11 }
 0x505   : > { %v2208_v62 = vpack.c.bf16 %v2182_v57, %v2180_v27  ;;  %v2122_v47 = vpop.f32.mrb[44].mxu1 }
 0x506   : > { %v2123_v6 = vadd.f32 %v2122_v47, %v3924_v33  ;;  %v2124_v22 = vpop.f32.mrb[45].mxu1 }
 0x507   : > { %v2125_v30 = vadd.f32 %v2124_v22, %v3924_v33  ;;  %v2126_v14 = vpop.f32.mrb[46].mxu1  ;;  %2248 = vmatprep.subr.bf16.mxu0 %v2208_v62 }
 0x508   : > { %v2127_v59 = vadd.f32 %v2126_v14, %v3925_v48  ;;  %v2128_v49 = vpop.f32.mrb[47].mxu1  ;;  %2249 = vmatpush1.bf16.msra.mxu0 %v2207_v31  ;;  %v2183_v8 = vmax.f32 %v2123_v6, 0.0  ;;  %v3932_v6 = vld [vmem:[#allocation16_spill] sm:$0xff] }
 0x509   : > { %v2129_v19 = vadd.f32 %v2128_v49, %v3925_v48  ;;  %v2184_v5 = vmax.f32 %v2125_v30, 0.0 }
 0x50a   : > { %v2185_v42 = vmax.f32 %v2127_v59, 0.0  ;;  %v3933_v59 = vld [vmem:[#allocation21_spill] sm:$0xff] }
 0x50b   : > { %v2186_v15 = vmax.f32 %v2129_v19, 0.0 }
 0x50c   : > { %v2209_v3 = vpack.c.bf16 %v2185_v42, %v2183_v8 }
 0x50d   : > { %v2210_v9 = vpack.c.bf16 %v2186_v15, %v2184_v5  ;;  %v2132_v41 = vpop.f32.mrb[48].mxu1 }
 0x50e   : > { %v2133_v32 = vadd.f32 %v2132_v41, %v3926_v56  ;;  %v2134_v38 = vpop.f32.mrb[49].mxu1 }
 0x50f   : > { %v2135_v13 = vadd.f32 %v2134_v38, %v3926_v56  ;;  %v2136_v58 = vpop.f32.mrb[50].mxu1  ;;  %2250 = vmatprep.subr.bf16.mxu0 %v2210_v9  ;;  %v2891_v56 = vld [vmem:[%s3852_s9] sm:$0xff]  }
 0x510   : > { %v2137_v54 = vadd.f32 %v2136_v58, %v3927_v51  ;;  %v2138_v1 = vpop.f32.mrb[51].mxu1  ;;  %2251 = vmatpush1.bf16.msra.mxu0 %v2209_v3  ;;  %v2187_v0 = vmax.f32 %v2133_v32, 0.0  ;;  %v2892_v32 = vld [vmem:[%s3852_s9 + $0x8] ss:$0 sps:$4 sm:$0x11]  }
 0x511   : > { %v2139_v46 = vadd.f32 %v2138_v1, %v3927_v51  ;;  %v2188_v29 = vmax.f32 %v2135_v13, 0.0  ;;  %v3934_v13 = vld [vmem:[#allocation20_spill] sm:$0xff] }
 0x512   : > { %v2189_v60 = vmax.f32 %v2137_v54, 0.0 }
 0x513   : > { %v2190_v36 = vmax.f32 %v2139_v46, 0.0  ;;  %v3935_v46 = vld [vmem:[#allocation22_spill] sm:$0xff] }
 0x514   : > { %v2211_v18 = vpack.c.bf16 %v2189_v60, %v2187_v0  ;;  %v3936_v60 = vld [vmem:[#allocation26_spill] sm:$0xff] }
 0x515   : > { %v2212_v53 = vpack.c.bf16 %v2190_v36, %v2188_v29  ;;  %v2142_v10 = vpop.f32.mrb[52].mxu1 }
 0x516   : > { %v2143_v24 = vadd.f32 %v2142_v10, %v3928_v40  ;;  %v2144_v61 = vpop.f32.mrb[53].mxu1 }
 0x517   : > { %v2145_v34 = vadd.f32 %v2144_v61, %v3928_v40  ;;  %v2146_v17 = vpop.f32.mrb[54].mxu1  ;;  %2252 = vmatprep.subr.bf16.mxu0 %v2212_v53  ;;  %v3938_v40 = vld [vmem:[#allocation28_spill] sm:$0xff] }
 0x518   : > { %v2147_v43 = vadd.f32 %v2146_v17, %v3929_v50  ;;  %v2148_v16 = vpop.f32.mrb[55].mxu1  ;;  %2253 = vmatpush1.bf16.msra.mxu0 %v2211_v18  ;;  %v2191_v20 = vmax.f32 %v2143_v24, 0.0  ;;  %v3937_v18 = vld [vmem:[#allocation23_spill] sm:$0xff] }
 0x519   : > { %v2149_v52 = vadd.f32 %v2148_v16, %v3929_v50  ;;  %v2192_v4 = vmax.f32 %v2145_v34, 0.0  ;;  %v3939_v34 = vld [vmem:[#allocation29_spill] sm:$0xff] }
 0x51a   : > { %v2193_v37 = vmax.f32 %v2147_v43, 0.0 }
 0x51b   : > { %v2194_v28 = vmax.f32 %v2149_v52, 0.0  ;;  %v3940_v52 = vld [vmem:[#allocation18_spill] sm:$0xff] }
 0x51c   : > { %v2213_v44 = vpack.c.bf16 %v2193_v37, %v2191_v20 }
 0x51d   : > { %v2214_v45 = vpack.c.bf16 %v2194_v28, %v2192_v4  ;;  %v2152_v26 = vpop.f32.mrb[56].mxu1 }
 0x51e   : > { %v2153_v21 = vadd.f32 %v2152_v26, %v3930_v23  ;;  %v2154_v55 = vpop.f32.mrb[57].mxu1 }
 0x51f   : > { %v2155_v35 = vadd.f32 %v2154_v55, %v3930_v23  ;;  %v2156_v7 = vpop.f32.mrb[58].mxu1  ;;  %2254 = vmatprep.subr.bf16.mxu0 %v2214_v45 }
 0x520   : > { %v2157_v25 = vadd.f32 %v2156_v7, %v3931_v2  ;;  %v2158_v12 = vpop.f32.mrb[59].mxu1  ;;  %2255 = vmatpush1.bf16.msra.mxu0 %v2213_v44  ;;  %v2195_v39 = vmax.f32 %v2153_v21, 0.0  ;;  %v3941_v44 = vld [vmem:[#allocation24_spill] sm:$0xff]  ;;  %v3942_v21 = vld [vmem:[#allocation25_spill] sm:$0xff]  ;;  %v3943_v7 = vld [vmem:[#allocation30_spill] sm:$0xff] }
 0x521   : > { %v2159_v11 = vadd.f32 %v2158_v12, %v3931_v2  ;;  %v2196_v57 = vmax.f32 %v2155_v35, 0.0  ;;  %v3944_v12 = vld [vmem:[#allocation27_spill] sm:$0xff] }
 0x522   : > { %v2197_v27 = vmax.f32 %v2157_v25, 0.0 }
 0x523   : > { %v2198_v31 = vmax.f32 %v2159_v11, 0.0 }
 0x524   : > { %v2215_v62 = vpack.c.bf16 %v2197_v27, %v2195_v39 }
 0x525   : > { %v2216_v47 = vpack.c.bf16 %v2198_v31, %v2196_v57  ;;  %v2162_v33 = vpop.f32.mrb[60].mxu1 }
 0x526   : > { %v2163_v22 = vadd.f32 %v2162_v33, %v3932_v6  ;;  %v2164_v30 = vpop.f32.mrb[61].mxu1 }
 0x527   : > { %v2165_v14 = vadd.f32 %v2164_v30, %v3932_v6  ;;  %v2166_v48 = vpop.f32.mrb[62].mxu1  ;;  %2256 = vmatprep.subr.bf16.mxu0 %v2216_v47 }
 0x528   : > { %v2167_v49 = vadd.f32 %v2166_v48, %v3933_v59  ;;  %v2168_v19 = vpop.f32.mrb[63].mxu1  ;;  %2257 = vmatpush1.bf16.msra.mxu0 %v2215_v62  ;;  %v2199_v42 = vmax.f32 %v2163_v22, 0.0 }
 0x529   : > { %v2169_v8 = vadd.f32 %v2168_v19, %v3933_v59  ;;  %v2200_v15 = vmax.f32 %v2165_v14, 0.0 }
 0x52a   : > { %v2201_v5 = vmax.f32 %v2167_v49, 0.0 }
 0x52b   : > { %v2202_v3 = vmax.f32 %v2169_v8, 0.0 }
 0x52c   : > { %v2217_v9 = vpack.c.bf16 %v2201_v5, %v2199_v42 }
 0x52d   : > { %v2218_v41 = vpack.c.bf16 %v2202_v3, %v2200_v15 }
 0x52f   : > { %2258 = vmatprep.subr.bf16.mxu0 %v2218_v41 }
 0x530   : > { %2259 = vmatpush1.bf16.msra.mxu0 %v2217_v9 }
 0x533   : > { %2277 = vmatmul.mubr.bf16.vlgmr.msra.gmra.mrb[64].mxu0 %v2891_v56 }
 0x534   : > { %2286 = vmatprep.mubr.bf16.mxu0 %v3915_v63 }
 0x53b   : > { %2287 = vmatmul.mubr.bf16.gmra.mrb[68].mxu0 %v2892_v32 }
 0x606   : > { %v2278_v38 = vpop.f32.mrb[64].mxu0 }
 0x607   : > { %v2279_v58 = vadd.f32 %v2278_v38, %v3934_v13  ;;  %v2280_v51 = vpop.f32.mrb[65].mxu0 }
 0x608   : > { %v2281_v54 = vadd.f32 %v2280_v51, %v3934_v13  ;;  %v2282_v1 = vpop.f32.mrb[66].mxu0 }
 0x609   : > { %v2353_v0 = vmul.f32 %v3935_v46, %v2279_v58  ;;  %v2283_v63 = vadd.f32 %v2282_v1, %v3936_v60  ;;  %v2284_v29 = vpop.f32.mrb[67].mxu0 }
 0x60a   : > { %v2733_v36 = vpack.c.bf16 %v2281_v54, %v2279_v58  ;;  %v2354_v53 = vmul.f32 %v3937_v18, %v2281_v54  ;;  %v2285_v10 = vadd.f32 %v2284_v29, %v3936_v60 }
 0x60b   : > { %v2355_v24 = vmul.f32 %v3938_v40, %v2283_v63 }
 0x60c   : > { %2315 = vst [vmem:[%s538_s14] sm:$0xff] %v2733_v36  ;;  %v2734_v61 = vpack.c.bf16 %v2285_v10, %v2283_v63  ;;  %v2356_v17 = vmul.f32 %v3939_v34, %v2285_v10  ;;  %v2359_v50 = vadd.f32 %v2354_v53, %v2353_v0 }
 0x60e   : > { %2316 = vst [vmem:[%s538_s14 + $0x8] sm:$0xff] %v2734_v61  ;;  %v2288_v43 = vpop.f32.mrb[68].mxu0  ;;  %2360 = vadd.xlane.f32.xlu0 %v2359_v50  ;;  %v2362_v16 = vadd.f32 %v2356_v17, %v2355_v24 }
 0x60f   : > { %v2289_v20 = vadd.f32 %v2288_v43, %v3940_v52  ;;  %v2290_v37 = vpop.f32.mrb[69].mxu0 }
 0x610   : > { %v2291_v4 = vadd.f32 %v2290_v37, %v3940_v52  ;;  %2363 = vadd.xlane.f32.xlu1 %v2362_v16  ;;  %v2292_v28 = vpop.f32.mrb[70].mxu0 }
 0x611   : > { %v2357_v45 = vmul.f32 %v3941_v44, %v2289_v20  ;;  %v2293_v26 = vpop.f32.mrb[71].mxu0 }
 0x612   : > { %v2735_v23 = vpack.c.bf16 %v2291_v4, %v2289_v20  ;;  %v2358_v55 = vmul.f32 %v3942_v21, %v2291_v4 }
 0x613   : > { %v2366_v35 = vsel %vm2365_vm3, %v2357_v45, 0.0 }
 0x614   : > { %2317 = vst [vmem:[%s538_s14 + $0x10] sm:$0x11] %v2735_v23  ;;  %2378 = vadd.xlane.f32.xlu1 %v3943_v7  ;;  %v2367_v2 = vsel %vm2365_vm3, %v2358_v55, 0.0 }
 0x615   : > { %v2368_v25 = vadd.f32 %v2367_v2, %v2366_v35 }
 0x617   : > { %2369 = vadd.xlane.f32.xlu0 %v2368_v25 }
 0x61b   : > { %2383 = vadd.xlane.f32.xlu0 %v3944_v12 }
 0x69b   : > { %v2361_v11 = vpop.xlane.xlu0 %2360 }
 0x69c   : > { %2389 = vst.msk [vmem:[%s548_s17] sm:$0xff] %vm2388_vm8, %v2361_v11 }
 0x69d   : > { %v2364_v39 = vpop.xlane.xlu1 %2363 }
 0x69e   : > { %2390 = vst.msk [vmem:[%s548_s17 + $0x8] sm:$0xff] %vm2388_vm8, %v2364_v39 }
 0x6a1   : > { %v2379_v27 = vpop.xlane.xlu1 %2378 }
 0x6a2   : > { %2394 = vst.msk [vmem:[%s3599_s21 + $0x8] sm:$0xff] %vm2388_vm8, %v2379_v27 }
 0x6a4   : > { %v2370_v57 = vpop.xlane.xlu0 %2369 }
 0x6a5   : > { %2392 = vst.msk [vmem:[%s548_s17 + $0x10] sm:$0x3] %vm2391_vm9, %v2370_v57 }
 0x6a8   : > { %v2384_v31 = vpop.xlane.xlu0 %2383 }
 0x6a9   : > { %2395 = vst.msk [vmem:[%s3599_s21 + $0x10] sm:$0x3] %vm2391_vm9, %v2384_v31 }
 0x6aa PF: > { %s24_s27 = sadd.s32 1, %s2915_s27   ;;  %s3945_s25 = smov %s2911_s26 }
 0x6ab   : > { %p21_p5 = scmp.ge.s32.totalorder %s24_s27, 4   ;;  %s3946_s26 = smov %s3948_s28 }
 0x6ad   :  { %23 = sbr.rel (!%p21_p5) target bundleno = 2 (0x2), region = 125 }

</bundles_post_ra>
